<compile_context>
chip_gen: v7x
topology: tpu7x:2x2x1
jax: 0.10.0
libtpu: 0.0.40
codegen_flags: <defaults>
</compile_context>

<pallas_src>
import functools

import jax
import jax.numpy as jnp
from jax.experimental import pallas as pl
from jax.experimental.pallas import tpu as pltpu

EPS = 1e-6


def _silu(v):
    # nn.SiLU
    return v * jax.nn.sigmoid(v)


def _sum_over_m_lanes(t, m, h):
    """t: (TI, m*h). Returns same-shaped array where every lane (m*h + f)
    holds sum_m t[:, m*h + f] (i.e. the M-reduction, already broadcast back
    over M). Uses cheap XLU lane rotations; no reshape / relayout."""
    if m == 1:
        return t
    if m & (m - 1) == 0:  # power of two -> log tree
        shift = (m // 2) * h
        while shift >= h:
            t = t + pltpu.roll(t, shift, axis=1)
            shift //= 2
        return t
    acc = t
    for k in range(1, m):
        acc = acc + pltpu.roll(t, k * h, axis=1)
    return acc


def _equivariant_silu(y, m, h):
    """EquivariantNonLinearity (norm=False) on lane-flattened y: (TI, m*h)."""
    sumsq = _sum_over_m_lanes(y * y, m, h)        # every lane: sum_m y^2
    inv = jnp.sqrt(sumsq + EPS)                   # invariant, replicated over m
    return y * _silu(inv)                         # scale broadcast is free


def mlp_kernel(x_ref, w1_ref, w2_ref, w3_ref, o_ref, *, m, h):
    x = x_ref[...].astype(jnp.float32)            # (TI, m*nin)
    w1 = w1_ref[...].astype(jnp.float32)          # (m*nin, m*h)  block-diag
    w2 = w2_ref[...].astype(jnp.float32)          # (m*h,  m*h)   block-diag
    w3 = w3_ref[...].astype(jnp.float32)          # (m*h,  m*nout) block-diag

    y = jnp.dot(x, w1, preferred_element_type=jnp.float32)   # Linear(nin, h)
    y = _equivariant_silu(y, m, h)
    y = jnp.dot(y, w2, preferred_element_type=jnp.float32)   # Linear(h, h)
    y = _equivariant_silu(y, m, h)
    y = jnp.dot(y, w3, preferred_element_type=jnp.float32)   # Linear(h, nout)

    o_ref[...] = y.astype(o_ref.dtype)            # (TI, m*nout) lane-dense


def mlp_forward(x, w1_t, w2_t, w3_t, *, ti=128):
    """x: (I, M, nin); w*_t already transposed to (in, out)."""
    I, M, NIN = x.shape
    H = w1_t.shape[1]
    NOUT = w3_t.shape[1]

    # Lane-dense flattening of the (m, f) axes (free, contiguous reshape) and
    # tiny block-diagonal weights kron(I_M, W) built on the XLA side.
    xf = x.reshape(I, M * NIN)
    eye = jnp.eye(M, dtype=jnp.float32)
    w1b = jnp.kron(eye, w1_t.astype(jnp.float32))   # (M*NIN, M*H)
    w2b = jnp.kron(eye, w2_t.astype(jnp.float32))   # (M*H,  M*H)
    w3b = jnp.kron(eye, w3_t.astype(jnp.float32))   # (M*H,  M*NOUT)

    # Tile over I; keep the sublane dim a multiple of 8 and pad any remainder.
    ti = max(8, min(ti, I))
    ti = (ti // 8) * 8
    grid = pl.cdiv(I, ti)
    i_pad = grid * ti
    if i_pad != I:
        xf = jnp.pad(xf, ((0, i_pad - I), (0, 0)))

    out_flat = pl.pallas_call(
        functools.partial(mlp_kernel, m=M, h=H),
        out_shape=jax.ShapeDtypeStruct((i_pad, M * NOUT), x.dtype),
        grid_spec=pltpu.PrefetchScalarGridSpec(
            num_scalar_prefetch=0,
            grid=(grid,),
            in_specs=[
                pl.BlockSpec((ti, M * NIN), lambda i: (i, 0)),
                pl.BlockSpec((M * NIN, M * H), lambda i: (0, 0)),
                pl.BlockSpec((M * H, M * H), lambda i: (0, 0)),
                pl.BlockSpec((M * H, M * NOUT), lambda i: (0, 0)),
            ],
            out_specs=pl.BlockSpec((ti, M * NOUT), lambda i: (i, 0)),
        ),
        compiler_params=pltpu.CompilerParams(
            dimension_semantics=("parallel",)),
    )(xf, w1b, w2b, w3b)

    return out_flat[:I].reshape(I, M, NOUT)


def mlp_reference(x, w1_t, w2_t, w3_t):
    """Pure-JAX reference mirroring the PyTorch Sequential."""
    def equiv(y):
        inv = jnp.sqrt(jnp.einsum('imf,imf->if', y, y) + EPS)
        return _silu(inv)[:, None, :] * y

    y = jnp.einsum('imf,fg->img', x, w1_t)
    y = equiv(y)
    y = jnp.einsum('imf,fg->img', y, w2_t)
    y = equiv(y)
    return jnp.einsum('imf,fg->img', y, w3_t)


if __name__ == "__main__":
    # Shapes consistent with the module's forward; I big enough that the
    # tiling (ti=128, 4 grid steps) is exercised, but still small.
    I, M = 512, 8          # samples, equivariant components (m)
    NIN, NH, NOUT = 32, 32, 16

    key = jax.random.PRNGKey(0)
    kx, k1, k2, k3 = jax.random.split(key, 4)

    x = jax.random.normal(kx, (I, M, NIN), dtype=jnp.float32)

    # nn.Linear weights are (out, in); init deterministically (uniform with
    # the PyTorch default bound 1/sqrt(fan_in)) and pass transposed (in, out).
    def init_w(k, fan_in, fan_out):
        bound = 1.0 / jnp.sqrt(fan_in)
        w = jax.random.uniform(k, (fan_out, fan_in), jnp.float32, -bound, bound)
        return w.T  # (in, out)

    w1_t = init_w(k1, NIN, NH)
    w2_t = init_w(k2, NH, NH)
    w3_t = init_w(k3, NH, NOUT)

    out = mlp_forward(x, w1_t, w2_t, w3_t, ti=128)
    out = jax.block_until_ready(out)

    ref = mlp_reference(x, w1_t, w2_t, w3_t)
    assert out.shape == (I, M, NOUT)
    assert jnp.allclose(out, ref, atol=1e-4, rtol=1e-4), "mismatch vs reference"

    print("KERNEL_OK")
</pallas_src>

<mosaic_0001>
module attributes {stable_mosaic.version = 11 : i64} {
  func.func @mlp_kernel(%arg0: i32, %arg1: memref<128x256xf32, #tpu.memory_space<vmem>>, %arg2: memref<256x256xf32, #tpu.memory_space<vmem>>, %arg3: memref<256x256xf32, #tpu.memory_space<vmem>>, %arg4: memref<256x128xf32, #tpu.memory_space<vmem>>, %arg5: memref<128x128xf32, #tpu.memory_space<vmem>>) attributes {dimension_semantics = [#tpu.dimension_semantics<parallel>], iteration_bounds = array<i64: 4>, scalar_prefetch = 0 : i64, scratch_operands = 0 : i64, tpu.core_type = #tpu.core_type<tc>, window_params = [{transform_indices = @transform_0, window_bounds = array<i64: 128, 256>}, {pipeline_mode = #tpu.pipeline_mode<synchronous>, transform_indices = @transform_1, window_bounds = array<i64: 256, 256>}, {pipeline_mode = #tpu.pipeline_mode<synchronous>, transform_indices = @transform_2, window_bounds = array<i64: 256, 256>}, {pipeline_mode = #tpu.pipeline_mode<synchronous>, transform_indices = @transform_3, window_bounds = array<i64: 256, 128>}, {transform_indices = @transform_4, window_bounds = array<i64: 128, 128>}]} {
    %c0 = arith.constant 0 : index
    %c0_0 = arith.constant 0 : index
    %0 = vector.load %arg1[%c0, %c0_0] : memref<128x256xf32, #tpu.memory_space<vmem>>, vector<128x256xf32>
    %c0_1 = arith.constant 0 : index
    %c0_2 = arith.constant 0 : index
    %1 = vector.load %arg2[%c0_1, %c0_2] : memref<256x256xf32, #tpu.memory_space<vmem>>, vector<256x256xf32>
    %c0_3 = arith.constant 0 : index
    %c0_4 = arith.constant 0 : index
    %2 = vector.load %arg3[%c0_3, %c0_4] : memref<256x256xf32, #tpu.memory_space<vmem>>, vector<256x256xf32>
    %c0_5 = arith.constant 0 : index
    %c0_6 = arith.constant 0 : index
    %3 = vector.load %arg4[%c0_5, %c0_6] : memref<256x128xf32, #tpu.memory_space<vmem>>, vector<256x128xf32>
    %cst = arith.constant dense<0.000000e+00> : vector<128x256xf32>
    %4 = tpu.matmul %0, %1, %cst {dimension_numbers = #tpu.dot_dimension_numbers<[1], [0], [0], [1], [0, 0, 1, 1], [], []>} : vector<128x256xf32>, vector<256x256xf32>, vector<128x256xf32> -> vector<128x256xf32>
    %5 = arith.mulf %4, %4 : vector<128x256xf32>
    %c128_i32 = arith.constant 128 : i32
    %6 = tpu.dynamic_rotate %5 by %c128_i32 dim 1 : vector<128x256xf32>, i32 -> vector<128x256xf32>
    %7 = arith.addf %5, %6 : vector<128x256xf32>
    %c64_i32 = arith.constant 64 : i32
    %8 = tpu.dynamic_rotate %7 by %c64_i32 dim 1 : vector<128x256xf32>, i32 -> vector<128x256xf32>
    %9 = arith.addf %7, %8 : vector<128x256xf32>
    %c32_i32 = arith.constant 32 : i32
    %10 = tpu.dynamic_rotate %9 by %c32_i32 dim 1 : vector<128x256xf32>, i32 -> vector<128x256xf32>
    %11 = arith.addf %9, %10 : vector<128x256xf32>
    %cst_7 = arith.constant 9.99999997E-7 : f32
    %12 = vector.broadcast %cst_7 : f32 to vector<128x256xf32>
    %13 = arith.addf %11, %12 : vector<128x256xf32>
    %14 = math.sqrt %13 : vector<128x256xf32>
    %15 = arith.negf %14 : vector<128x256xf32>
    %16 = math.exp %15 : vector<128x256xf32>
    %cst_8 = arith.constant 1.000000e+00 : f32
    %17 = vector.broadcast %cst_8 : f32 to vector<128x256xf32>
    %18 = arith.addf %17, %16 : vector<128x256xf32>
    %19 = arith.divf %17, %18 : vector<128x256xf32>
    %20 = arith.mulf %14, %19 : vector<128x256xf32>
    %21 = arith.mulf %4, %20 : vector<128x256xf32>
    %cst_9 = arith.constant dense<0.000000e+00> : vector<128x256xf32>
    %22 = tpu.matmul %21, %2, %cst_9 {dimension_numbers = #tpu.dot_dimension_numbers<[1], [0], [0], [1], [0, 0, 1, 1], [], []>} : vector<128x256xf32>, vector<256x256xf32>, vector<128x256xf32> -> vector<128x256xf32>
    %23 = arith.mulf %22, %22 : vector<128x256xf32>
    %c128_i32_10 = arith.constant 128 : i32
    %24 = tpu.dynamic_rotate %23 by %c128_i32_10 dim 1 : vector<128x256xf32>, i32 -> vector<128x256xf32>
    %25 = arith.addf %23, %24 : vector<128x256xf32>
    %c64_i32_11 = arith.constant 64 : i32
    %26 = tpu.dynamic_rotate %25 by %c64_i32_11 dim 1 : vector<128x256xf32>, i32 -> vector<128x256xf32>
    %27 = arith.addf %25, %26 : vector<128x256xf32>
    %c32_i32_12 = arith.constant 32 : i32
    %28 = tpu.dynamic_rotate %27 by %c32_i32_12 dim 1 : vector<128x256xf32>, i32 -> vector<128x256xf32>
    %29 = arith.addf %27, %28 : vector<128x256xf32>
    %cst_13 = arith.constant 9.99999997E-7 : f32
    %30 = vector.broadcast %cst_13 : f32 to vector<128x256xf32>
    %31 = arith.addf %29, %30 : vector<128x256xf32>
    %32 = math.sqrt %31 : vector<128x256xf32>
    %33 = arith.negf %32 : vector<128x256xf32>
    %34 = math.exp %33 : vector<128x256xf32>
    %cst_14 = arith.constant 1.000000e+00 : f32
    %35 = vector.broadcast %cst_14 : f32 to vector<128x256xf32>
    %36 = arith.addf %35, %34 : vector<128x256xf32>
    %37 = arith.divf %35, %36 : vector<128x256xf32>
    %38 = arith.mulf %32, %37 : vector<128x256xf32>
    %39 = arith.mulf %22, %38 : vector<128x256xf32>
    %cst_15 = arith.constant dense<0.000000e+00> : vector<128x128xf32>
    %40 = tpu.matmul %39, %3, %cst_15 {dimension_numbers = #tpu.dot_dimension_numbers<[1], [0], [0], [1], [0, 0, 1, 1], [], []>} : vector<128x256xf32>, vector<256x128xf32>, vector<128x128xf32> -> vector<128x128xf32>
    %c0_16 = arith.constant 0 : index
    %c0_17 = arith.constant 0 : index
    %41 = vector.load %arg5[%c0_16, %c0_17] : memref<128x128xf32, #tpu.memory_space<vmem>>, vector<128x128xf32>
    tpu.vector_store %arg5[%c0_16, %c0_17], %40 {strides = array<i32>} : memref<128x128xf32, #tpu.memory_space<vmem>>, vector<128x128xf32>,
    return
  }
  func.func @transform_0(%arg0: i32) -> (i32, i32) {
    %c0_i32 = arith.constant 0 : i32
    %c0_i32_0 = arith.constant 0 : i32
    return %arg0, %c0_i32 : i32, i32
  }
  func.func @transform_1(%arg0: i32) -> (i32, i32) {
    %c0_i32 = arith.constant 0 : i32
    %c0_i32_0 = arith.constant 0 : i32
    %c0_i32_1 = arith.constant 0 : i32
    return %c0_i32, %c0_i32_0 : i32, i32
  }
  func.func @transform_2(%arg0: i32) -> (i32, i32) {
    %c0_i32 = arith.constant 0 : i32
    %c0_i32_0 = arith.constant 0 : i32
    %c0_i32_1 = arith.constant 0 : i32
    return %c0_i32, %c0_i32_0 : i32, i32
  }
  func.func @transform_3(%arg0: i32) -> (i32, i32) {
    %c0_i32 = arith.constant 0 : i32
    %c0_i32_0 = arith.constant 0 : i32
    %c0_i32_1 = arith.constant 0 : i32
    return %c0_i32, %c0_i32_0 : i32, i32
  }
  func.func @transform_4(%arg0: i32) -> (i32, i32) {
    %c0_i32 = arith.constant 0 : i32
    %c0_i32_0 = arith.constant 0 : i32
    return %arg0, %c0_i32 : i32, i32
  }
}

</mosaic_0001>

<bundles_post_ra>
// kernel: tpu_custom_call.1
= control target key start
LH: loop header
LB: loop body
LE: loop exit
PB: predicated region body
PF: predicated region fallthrough
CT: control target
= control target key end

     0   :  { %9 = vsyncpa [#allocation3], 0  ;;  %s3945_s0 = inlined_call_operand.hbm [shape: f32[512,256], index: 0, kind: input, shape index: {}]   ;;  %s3946_s1 = inlined_call_operand.hbm [shape: f32[256,256], index: 1, kind: input, shape index: {}]   ;;  %s3947_s2 = inlined_call_operand.hbm [shape: f32[256,256], index: 2, kind: input, shape index: {}]   ;;  %s3948_s3 = inlined_call_operand.hbm [shape: f32[256,128], index: 3, kind: input, shape index: {}]   ;;  %s3949_s4 = inlined_call_operand.hbm [shape: f32[512,128], index: 4, kind: output, shape index: {}]  }
   0x1   :  { %11 = vsyncpa [#allocation3 + $0x1], 0 }
   0x2   :  { %12 = vsyncpa [#allocation6], 0 }
   0x3   :  { %13 = vsyncpa [#allocation9], 0 }
   0x4   :  { %14 = vsyncpa [#allocation4], 0 }
   0x5   :  { %16 = vsyncpa [#allocation4 + $0x1], 0  ;;  %s2705_s15 = smov 0   ;;  %s2707_s16 = smov 0  }
   0x6   :  { %s2709_s17 = smov 0   ;;  %s2711_s18 = smov 0  }
   0x7 LB: > { %s2726_s19 = sadd.s32 4294967295, %s2665_s18   ;;  %s1888_s20 = sadd.s32 4294967294, %s2665_s18   ;;  %s2665_s18 = sphi %s2711_s18, %s3977_s18   ;;  %s2661_s17 = sphi %s2709_s17, %s3976_s17   ;;  %s2657_s16 = sphi %s2707_s16, %s3975_s16   ;;  %s2653_s15 = sphi %s2705_s15, %s3974_s15  }
   0x8   : > { %p42_p0 = scmp.ne.s32.totalorder %s2657_s16, %s2653_s15  ;;  %p3950_p1 = scmp.eq.s32.totalorder %s2726_s19, 0 }
   0x9   : > { %p135_p3 = scmp.eq.s32.totalorder %s1888_s20, 3  ;;  %p1889_p5 = scmp.ge.s32.totalorder %s2665_s18, 1 }
   0xa   : > { %p2735_p4 = por %p3950_p1, %p42_p0  ;;  %p142_p7 = scmp.lt.s32.totalorder %s2665_s18, 5 }
   0xb   : > { %p2740_p6 = por %p135_p3, %p42_p0  ;;  %s2667_s24 = smov [#allocation5]  }
   0xc   : > { %s3955_s21 = scalar_select %p2735_p4, 1, 0 }
   0xd   : > { %s3956_s22 = scalar_select %p2740_p6, 1, 0 }
   0xe   : > { %p2745_p8 = pnand %p1889_p5, %p142_p7  ;;  %s154_s25 = sshll.u32 %s2667_s24, 4  ;;  %s2749_s25 = int_to_ptr.vmem [resolvable:$true] %s154_s25 }
   0xf   : > { %s2668_s27 = smov [#allocation7]   ;;  %s2669_s29 = smov [#allocation8]  }
  0x10   : > { %s3957_s23 = scalar_select %p2745_p8, 1, 0 }
  0x11   : > { %p2216_p9 = pneg %p2745_p8  ;;  %s167_s28 = sshll.u32 %s2668_s27, 4  ;;  %s2759_s28 = int_to_ptr.vmem [resolvable:$true] %s167_s28 }
  0x12   : > { %s2761_s30 = sshll.u32 %s2669_s29, 4  ;;  %s2477_s7 = scalar_lea.hbm %s3946_s1, 8192  ;;  %s181_s30 = int_to_ptr.vmem [resolvable:$true] %s2761_s30 }
  0x13   : > { %p2755_p10 = pnand %p2216_p9, %p3950_p1  ;;  %p2478_p11 = scmp.ne.s32.totalorder %s3946_s1, %s2477_s7 }
  0x14   : > { %p2484_p3 = scmp.lt.u32.totalorder %s2477_s7, %s3946_s1 }
  0x15   : > { %p2771_p12 = pneg %p2755_p10 }
  0x17   : > { %p2480_p13 = pnand %p2771_p12, %p2478_p11 }
  0x19   : > { %p2481_p0 = pneg %p2480_p13 }
  0x1b   : > { %p2486_p5 = pnand %p2484_p3, %p2481_p0 }
  0x1d   : > { %2489 = shalt.err (!%p2486_p5)
}
  0x1e   : > { %s2490_s13 = scalar_lea.vmem %s2749_s25, 8192  ;;  %p2498_p2 = scmp.lt.s32.totalorder %s2749_s25, %s2749_s25 }
  0x1f   : > { %p2491_p7 = scmp.ne.s32.totalorder %s2749_s25, %s2490_s13  ;;  %p2499_p6 = scmp.lt.s32.totalorder %s2490_s13, %s2490_s13 }
  0x21   : > { %p2493_p9 = pnand %p2491_p7, %p2771_p12  ;;  %p2500_p11 = por %p2499_p6, %p2498_p2 }
  0x23   : > { %p2494_p1 = pneg %p2493_p9 }
  0x25   : > { %p2501_p13 = pnand %p2500_p11, %p2494_p1 }
  0x27   : > { %2504 = shalt.err (!%p2501_p13)
}
  0x28   : > { %s2670_s14 = smov 256   ;;  %s2671_s20 = smov 16  }
  0x29   : > { %2219 = dma.hbm_to_vmem [thread:$0]  (!%p2755_p10), %s3946_s1, 8192, %s2749_s25, [#allocation6], %s2670_s14, %s2670_s14, %s2671_s20  }
  0x2a   : > { %s2505_s6 = scalar_lea.hbm %s3947_s2, 8192 }
  0x2b   : > { %p2506_p1 = scmp.ne.s32.totalorder %s3947_s2, %s2505_s6  ;;  %p2512_p0 = scmp.lt.u32.totalorder %s2505_s6, %s3947_s2 }
  0x2d   : > { %p2508_p2 = pnand %p2506_p1, %p2771_p12 }
  0x2f   : > { %p2509_p6 = pneg %p2508_p2 }
  0x31   : > { %p2514_p3 = pnand %p2512_p0, %p2509_p6 }
  0x33   : > { %2517 = shalt.err (!%p2514_p3)
}
  0x34   : > { %s2518_s25 = scalar_lea.vmem %s2759_s28, 8192  ;;  %p2526_p11 = scmp.lt.s32.totalorder %s2759_s28, %s2759_s28 }
  0x35   : > { %p2519_p5 = scmp.ne.s32.totalorder %s2759_s28, %s2518_s25  ;;  %p2527_p13 = scmp.lt.s32.totalorder %s2518_s25, %s2518_s25 }
  0x37   : > { %p2521_p7 = pnand %p2519_p5, %p2771_p12  ;;  %p2528_p1 = por %p2527_p13, %p2526_p11 }
  0x39   : > { %p2522_p9 = pneg %p2521_p7 }
  0x3b   : > { %p2529_p2 = pnand %p2528_p1, %p2522_p9 }
  0x3d   : > { %2532 = shalt.err (!%p2529_p2)
}
  0x3e   : > { %2222 = dma.hbm_to_vmem [thread:$0]  (!%p2755_p10), %s3947_s2, 8192, %s2759_s28, [#allocation6], %s2670_s14, %s2670_s14, %s2671_s20  }
  0x3f   : > { %s2533_s29 = scalar_lea.hbm %s3948_s3, 4096 }
  0x40   : > { %p2534_p6 = scmp.ne.s32.totalorder %s3948_s3, %s2533_s29  ;;  %p2540_p5 = scmp.lt.u32.totalorder %s2533_s29, %s3948_s3 }
  0x42   : > { %p2536_p0 = pnand %p2534_p6, %p2771_p12 }
  0x44   : > { %p2537_p3 = pneg %p2536_p0 }
  0x46   : > { %p2542_p7 = pnand %p2540_p5, %p2537_p3 }
  0x48   : > { %2545 = shalt.err (!%p2542_p7)
}
  0x49   : > { %s2546_s9 = scalar_lea.vmem %s181_s30, 4096  ;;  %p2554_p1 = scmp.lt.s32.totalorder %s181_s30, %s181_s30 }
  0x4a   : > { %p2547_p9 = scmp.ne.s32.totalorder %s181_s30, %s2546_s9  ;;  %p2555_p2 = scmp.lt.s32.totalorder %s2546_s9, %s2546_s9 }
  0x4c   : > { %p2549_p11 = pnand %p2547_p9, %p2771_p12  ;;  %p2556_p4 = por %p2555_p2, %p2554_p1 }
  0x4e   : > { %p2550_p13 = pneg %p2549_p11 }
  0x50   : > { %p2557_p8 = pnand %p2556_p4, %p2550_p13 }
  0x52   : > { %2560 = shalt.err (!%p2557_p8)
}
  0x53   : > { %s2672_s28 = smov 128   ;;  %s2673_s10 = smov 8  }
  0x54   : > { %2225 = dma.hbm_to_vmem [thread:$0]  (!%p2755_p10), %s3948_s3, 4096, %s181_s30, [#allocation9], %s2672_s28, %s2672_s28, %s2673_s10  }
  0x55   : > { %s2841_s12 = sadd.s32 1, %s2665_s18   ;;  %s29_s24 = sadd.s32 1, %s2661_s17 }
  0x56   : > { %s26_s13 = ssub.s32 %s2665_s18, %s2841_s12  ;;  %p36_p8 = scmp.ne.s32.totalorder %s2661_s17, %s2657_s16 }
  0x57   : > { %p27_p4 = scmp.eq.s32.totalorder %s26_s13, 0  ;;  %p37_p12 = scmp.eq.s32.totalorder %s2665_s18, 0 }
  0x58   : > { %p2237_p6 = scmp.lt.s32.totalorder %s2665_s18, 4  ;;  %p3960_p3 = scmp.eq.s32.totalorder %s2726_s19, 3 }
  0x59   : > { %s2851_s27 = scalar_select %p27_p4, %s2661_s17, %s29_s24  }
  0x5a   : > { %p38_p0 = por %p37_p12, %p36_p8  ;;  %p2855_p5 = por %p3960_p3, %p36_p8 }
  0x5b   : > { %s194_s26 = sand.u32 1, %s2661_s17   ;;  %s1942_s5 = sshll.u32 %s2665_s18, 12 }
  0x5c   : > { %s1894_s30 = sshll.u32 %s194_s26, 8  ;;  %s2864_s8 = scalar_lea.hbm %s3945_s0, %s1942_s5 }
  0x5d   : > { %s198_s9 = scalar_lea.vmem [#allocation2], %s1894_s30  ;;  %p2866_p10 = pnand %p2237_p6, %p38_p0 }
  0x5e   : > { %s206_s28 = sshll.u32 %s198_s9, 4  ;;  %s2872_s11 = scalar_lea.sflag [#allocation3], %s194_s26  ;;  %s2870_s28 = int_to_ptr.vmem [resolvable:$true] %s206_s28 }
  0x5f   : > { %s2561_s25 = scalar_lea.hbm %s2864_s8, 4096  ;;  %p2563_p9 = pneg %p2866_p10 }
  0x60   : > { %p2562_p7 = scmp.ne.s32.totalorder %s2864_s8, %s2561_s25  ;;  %s2566_s5 = scalar_lea.hbm %s3945_s0, 16384 }
  0x61   : > { %p2567_p1 = scmp.lt.u32.totalorder %s2864_s8, %s3945_s0  ;;  %p2568_p2 = scmp.lt.u32.totalorder %s2566_s5, %s2561_s25 }
  0x62   : > { %p2564_p11 = pnand %p2563_p9, %p2562_p7  ;;  %p2570_p8 = scmp.lt.u32.totalorder %s2561_s25, %s2864_s8 }
  0x63   : > { %p2569_p4 = por %p2568_p2, %p2567_p1 }
  0x64   : > { %p2565_p13 = pneg %p2564_p11 }
  0x65   : > { %p2571_p12 = por %p2570_p8, %p2569_p4 }
  0x67   : > { %p2572_p6 = pnand %p2571_p12, %p2565_p13 }
  0x69   : > { %2575 = shalt.err (!%p2572_p6)
}
  0x6a   : > { %s2576_s26 = scalar_lea.vmem %s2870_s28, 4096  ;;  %s2674_s7 = smov [#allocation2]  }
  0x6b   : > { %p2577_p0 = scmp.ne.s32.totalorder %s2870_s28, %s2576_s26  ;;  %s2581_s9 = sshll.u32 %s2674_s7, 4  ;;  %s2582_s9 = int_to_ptr.vmem [resolvable:$false] %s2581_s9 }
  0x6c   : > { %s2583_s13 = scalar_lea.vmem %s2582_s9, 8192  ;;  %p2584_p11 = scmp.lt.s32.totalorder %s2870_s28, %s2582_s9 }
  0x6d   : > { %p2579_p3 = pnand %p2577_p0, %p2563_p9  ;;  %p2585_p1 = scmp.lt.s32.totalorder %s2583_s13, %s2576_s26 }
  0x6f   : > { %p2580_p7 = pneg %p2579_p3  ;;  %p2586_p2 = por %p2585_p1, %p2584_p11 }
  0x71   : > { %p2587_p4 = pnand %p2586_p2, %p2580_p7 }
  0x73   : > { %2590 = shalt.err (!%p2587_p4)
}
  0x74   : > { %2229 = dma.hbm_to_vmem [thread:$0]  (!%p2866_p10), %s2864_s8, 4096, %s2870_s28, %s2872_s11, %s2670_s14, %s2670_s14, %s2671_s20  }
  0x75   : > { %p3963_p9 = scmp.ne.s32.totalorder %s3957_s23, 0 }
  0x77   : > { %218 = sbr.rel (%p3963_p9) target bundleno = 1492 (0x5d4), region = 36 }
  0x7e   : > { %s2906_s25 = sand.u32 1, %s2657_s16   ;;  %p3964_p13 = scmp.ne.s32.totalorder %s3955_s21, 0 }
  0x7f   : > { %s1899_s24 = sshll.u32 %s2906_s25, 8  ;;  %s221_s5 = scalar_lea.sflag [#allocation3], %s2906_s25 }
  0x80   : > { %s2910_s30 = scalar_lea.vmem [#allocation2], %s1899_s24 }
  0x81   : > { %2636 = dma.done.wait (%p3964_p13), %s221_s5, 4096  }
  0x82   : > { %2638 = vsyncadd (%p3964_p13), %s221_s5, 4294963200  ;;  %p3965_p10 = scmp.eq.s32.totalorder %s2726_s19, 0 }
  0x84   : > { %2640 = dma.done.wait (%p3965_p10), [#allocation6], 16384   ;;  %p3966_p8 = pmov %p3965_p10 }
  0x86   : > { %2642 = vsyncadd (%p3966_p8), [#allocation6], 4294950912  ;;  %p3967_p12 = pmov %p3966_p8 }
  0x87   : > { %p3968_p6 = pmov %p3966_p8 }
  0x88   : > { %2644 = dma.done.wait (%p3967_p12), [#allocation9], 4096  }
  0x89   : > { %2646 = vsyncadd (%p3968_p6), [#allocation9], 4294963200  ;;  %v296_v0 = vld [vmem:[#allocation5 + $0x8] sm:$0xff]  ;;  %v298_v1 = vld [vmem:[#allocation5 + $0x18] sm:$0xff]  ;;  %s2675_s21 = smov 64   ;;  %s2676_s23 = smov 32  }
  0x8a   : > { %v295_v2 = vld [vmem:[#allocation5] sm:$0xff]  ;;  %v2024_v3 = vpack.c.bf16 %v298_v1, %v296_v0  ;;  %v297_v4 = vld [vmem:[#allocation5 + $0x10] sm:$0xff]  ;;  %v300_v5 = vld [vmem:[#allocation5 + $0x28] sm:$0xff]  ;;  %s1903_s14 = sshll.u32 %s2906_s25, 7  ;;  %s1943_s8 = sshll.u32 %s2726_s19, 11 }
  0x8b   : > { %v302_v6 = vld [vmem:[#allocation5 + $0x38] sm:$0xff]  ;;  %v2026_v7 = vpack.c.bf16 %v297_v4, %v295_v2  ;;  %v299_v9 = vld [vmem:[#allocation5 + $0x20] sm:$0xff]  ;;  %v301_v10 = vld [vmem:[#allocation5 + $0x30] sm:$0xff]  ;;  %s3877_s20 = scalar_lea.vmem [#allocation10], %s1903_s14  ;;  %s3899_s6 = scalar_lea.hbm %s3949_s4, %s1943_s8 }
  0x8c   : > { %v2028_v8 = vpack.c.bf16 %v302_v6, %v300_v5  ;;  %v304_v11 = vld [vmem:[#allocation5 + $0x48] sm:$0xff]  ;;  %2025 = vmatprep.subr.bf16.mxu0 %v2024_v3  ;;  %v306_v12 = vld [vmem:[#allocation5 + $0x58] sm:$0xff]  ;;  %v2030_v13 = vpack.c.bf16 %v301_v10, %v299_v9  ;;  %v303_v15 = vld [vmem:[#allocation5 + $0x40] sm:$0xff]  ;;  %s1786_s28 = sshll.u32 %s3877_s20, 4  ;;  %s1773_s26 = scalar_lea.sflag [#allocation4], %s2906_s25  ;;  %s3901_s28 = int_to_ptr.vmem [resolvable:$true] %s1786_s28 }
  0x8d   : > { %2027 = vmatpush1.bf16.msra.mxu0 %v2026_v7  ;;  %v2032_v14 = vpack.c.bf16 %v306_v12, %v304_v11  ;;  %v305_v16 = vld [vmem:[#allocation5 + $0x50] sm:$0xff]  ;;  %v308_v17 = vld [vmem:[#allocation5 + $0x68] sm:$0xff]  ;;  %v310_v18 = vld [vmem:[#allocation5 + $0x78] sm:$0xff]  ;;  %s2591_s7 = scalar_lea.vmem %s3901_s28, 2048  ;;  %s2677_s19 = smov [#allocation10]  }
  0x8e   : > { %2029 = vmatprep.subr.bf16.mxu0 %v2028_v8  ;;  %v2034_v19 = vpack.c.bf16 %v305_v16, %v303_v15  ;;  %v2036_v20 = vpack.c.bf16 %v310_v18, %v308_v17  ;;  %v307_v21 = vld [vmem:[#allocation5 + $0x60] sm:$0xff]  ;;  %v309_v22 = vld [vmem:[#allocation5 + $0x70] sm:$0xff]  ;;  %v312_v23 = vld [vmem:[#allocation5 + $0x88] sm:$0xff]  ;;  %p2592_p0 = scmp.ne.s32.totalorder %s3901_s28, %s2591_s7  ;;  %s2595_s9 = sshll.u32 %s2677_s19, 4  ;;  %s2596_s9 = int_to_ptr.vmem [resolvable:$false] %s2595_s9 }
  0x8f   : > { %v314_v24 = vld [vmem:[#allocation5 + $0x98] sm:$0xff]  ;;  %v2038_v25 = vpack.c.bf16 %v309_v22, %v307_v21  ;;  %v311_v27 = vld [vmem:[#allocation5 + $0x80] sm:$0xff]  ;;  %v313_v28 = vld [vmem:[#allocation5 + $0x90] sm:$0xff]  ;;  %s2597_s13 = scalar_lea.vmem %s2596_s9, 4096  ;;  %p2598_p11 = scmp.lt.s32.totalorder %s3901_s28, %s2596_s9 }
  0x90   : > { %v2040_v26 = vpack.c.bf16 %v314_v24, %v312_v23  ;;  %v316_v29 = vld [vmem:[#allocation5 + $0xa8] sm:$0xff]  ;;  %v318_v30 = vld [vmem:[#allocation5 + $0xb8] sm:$0xff]  ;;  %v2042_v31 = vpack.c.bf16 %v313_v28, %v311_v27  ;;  %v315_v33 = vld [vmem:[#allocation5 + $0xa0] sm:$0xff]  ;;  %p2593_p3 = pnand %p2592_p0, %p2855_p5  ;;  %p2599_p1 = scmp.lt.s32.totalorder %s2597_s13, %s2591_s7 }
  0x91   : > { %2031 = vmatpush1.bf16.msra.mxu0 %v2030_v13  ;;  %v2044_v32 = vpack.c.bf16 %v318_v30, %v316_v29  ;;  %v317_v34 = vld [vmem:[#allocation5 + $0xb0] sm:$0xff]  ;;  %v320_v35 = vld [vmem:[#allocation5 + $0xc8] sm:$0xff]  ;;  %v322_v36 = vld [vmem:[#allocation5 + $0xd8] sm:$0xff] }
  0x92   : > { %2033 = vmatprep.subr.bf16.mxu0 %v2032_v14  ;;  %v2046_v37 = vpack.c.bf16 %v317_v34, %v315_v33  ;;  %v2048_v38 = vpack.c.bf16 %v322_v36, %v320_v35  ;;  %v319_v39 = vld [vmem:[#allocation5 + $0xc0] sm:$0xff]  ;;  %v321_v40 = vld [vmem:[#allocation5 + $0xd0] sm:$0xff]  ;;  %v264_v41 = vld [vmem:[%s2910_s30 + $0x8] sm:$0xff]  ;;  %p2594_p7 = pneg %p2593_p3  ;;  %p2600_p2 = por %p2599_p1, %p2598_p11 }
  0x93   : > { %v324_v42 = vld [vmem:[#allocation5 + $0xe8] sm:$0xff]  ;;  %v326_v43 = vld [vmem:[#allocation5 + $0xf8] sm:$0xff]  ;;  %519 = vmatprep.mubr.f32.mxu0 %v264_v41  ;;  %v2050_v44 = vpack.c.bf16 %v321_v40, %v319_v39  ;;  %v323_v46 = vld [vmem:[#allocation5 + $0xe0] sm:$0xff] }
  0x94   : > { %v2052_v45 = vpack.c.bf16 %v326_v43, %v324_v42  ;;  %v325_v47 = vld [vmem:[#allocation5 + $0xf0] sm:$0xff]  ;;  %v328_v48 = vld [vmem:[#allocation5 + $0x108] sm:$0xff]  ;;  %v330_v49 = vld [vmem:[#allocation5 + $0x118] sm:$0xff]  ;;  %p2601_p4 = pnand %p2600_p2, %p2594_p7 }
  0x95   : > { %2035 = vmatpush1.bf16.msra.mxu0 %v2034_v19  ;;  %v2054_v50 = vpack.c.bf16 %v325_v47, %v323_v46  ;;  %v2056_v51 = vpack.c.bf16 %v330_v49, %v328_v48  ;;  %v327_v52 = vld [vmem:[#allocation5 + $0x100] sm:$0xff]  ;;  %v329_v53 = vld [vmem:[#allocation5 + $0x110] sm:$0xff]  ;;  %v332_v54 = vld [vmem:[#allocation5 + $0x128] sm:$0xff] }
  0x96   : > { %2037 = vmatprep.subr.bf16.mxu0 %v2036_v20  ;;  %v334_v55 = vld [vmem:[#allocation5 + $0x138] sm:$0xff]  ;;  %v2058_v56 = vpack.c.bf16 %v329_v53, %v327_v52  ;;  %v331_v58 = vld [vmem:[#allocation5 + $0x120] sm:$0xff]  ;;  %v333_v59 = vld [vmem:[#allocation5 + $0x130] sm:$0xff] }
  0x97   : > { %v2060_v57 = vpack.c.bf16 %v334_v55, %v332_v54  ;;  %v336_v60 = vld [vmem:[#allocation5 + $0x148] sm:$0xff]  ;;  %v338_v61 = vld [vmem:[#allocation5 + $0x158] sm:$0xff]  ;;  %v2062_v62 = vpack.c.bf16 %v333_v59, %v331_v58  ;;  %v335_v0 = vld [vmem:[#allocation5 + $0x140] sm:$0xff] }
  0x98   : > { %v2064_v63 = vpack.c.bf16 %v338_v61, %v336_v60  ;;  %v337_v1 = vld [vmem:[#allocation5 + $0x150] sm:$0xff]  ;;  %v340_v2 = vld [vmem:[#allocation5 + $0x168] sm:$0xff]  ;;  %v342_v3 = vld [vmem:[#allocation5 + $0x178] sm:$0xff] }
  0x99   : > { %2039 = vmatpush1.bf16.msra.mxu0 %v2038_v25  ;;  %v2066_v4 = vpack.c.bf16 %v337_v1, %v335_v0  ;;  %v2068_v5 = vpack.c.bf16 %v342_v3, %v340_v2  ;;  %v339_v6 = vld [vmem:[#allocation5 + $0x160] sm:$0xff]  ;;  %v341_v7 = vld [vmem:[#allocation5 + $0x170] sm:$0xff]  ;;  %v344_v8 = vld [vmem:[#allocation5 + $0x188] sm:$0xff] }
  0x9a   : > { %2041 = vmatprep.subr.bf16.mxu0 %v2040_v26  ;;  %v346_v9 = vld [vmem:[#allocation5 + $0x198] sm:$0xff]  ;;  %v2070_v10 = vpack.c.bf16 %v341_v7, %v339_v6  ;;  %v343_v12 = vld [vmem:[#allocation5 + $0x180] sm:$0xff]  ;;  %v345_v13 = vld [vmem:[#allocation5 + $0x190] sm:$0xff] }
  0x9b   : > { %v2072_v11 = vpack.c.bf16 %v346_v9, %v344_v8  ;;  %v348_v14 = vld [vmem:[#allocation5 + $0x1a8] sm:$0xff]  ;;  %v350_v15 = vld [vmem:[#allocation5 + $0x1b8] sm:$0xff]  ;;  %v2074_v16 = vpack.c.bf16 %v345_v13, %v343_v12  ;;  %v347_v18 = vld [vmem:[#allocation5 + $0x1a0] sm:$0xff] }
  0x9c   : > { %v2076_v17 = vpack.c.bf16 %v350_v15, %v348_v14  ;;  %v349_v19 = vld [vmem:[#allocation5 + $0x1b0] sm:$0xff]  ;;  %v352_v20 = vld [vmem:[#allocation5 + $0x1c8] sm:$0xff]  ;;  %v354_v21 = vld [vmem:[#allocation5 + $0x1d8] sm:$0xff] }
  0x9d   : > { %2043 = vmatpush1.bf16.msra.mxu0 %v2042_v31  ;;  %v2078_v22 = vpack.c.bf16 %v349_v19, %v347_v18  ;;  %v2080_v23 = vpack.c.bf16 %v354_v21, %v352_v20  ;;  %v351_v24 = vld [vmem:[#allocation5 + $0x1c0] sm:$0xff]  ;;  %v353_v25 = vld [vmem:[#allocation5 + $0x1d0] sm:$0xff]  ;;  %v356_v26 = vld [vmem:[#allocation5 + $0x1e8] sm:$0xff] }
  0x9e   : > { %2045 = vmatprep.subr.bf16.mxu0 %v2044_v32  ;;  %v358_v27 = vld [vmem:[#allocation5 + $0x1f8] sm:$0xff]  ;;  %v2082_v28 = vpack.c.bf16 %v353_v25, %v351_v24  ;;  %v355_v30 = vld [vmem:[#allocation5 + $0x1e0] sm:$0xff]  ;;  %v357_v31 = vld [vmem:[#allocation5 + $0x1f0] sm:$0xff] }
  0x9f   : > { %v2084_v29 = vpack.c.bf16 %v358_v27, %v356_v26  ;;  %v2086_v32 = vpack.c.bf16 %v357_v31, %v355_v30  ;;  %v263_v33 = vld [vmem:[%s2910_s30] sm:$0xff]  ;;  %v266_v34 = vld [vmem:[%s2910_s30 + $0x18] sm:$0xff]  ;;  %v265_v35 = vld [vmem:[%s2910_s30 + $0x10] sm:$0xff] }
  0xa0   : > { %v268_v36 = vld [vmem:[%s2910_s30 + $0x28] sm:$0xff]  ;;  %v269_v39 = vld [vmem:[%s2910_s30 + $0x30] sm:$0xff]  ;;  %v271_v41 = vld [vmem:[%s2910_s30 + $0x40] sm:$0xff] }
  0xa1   : > { %2047 = vmatpush1.bf16.msra.mxu0 %v2046_v37  ;;  %v267_v37 = vld [vmem:[%s2910_s30 + $0x20] sm:$0xff]  ;;  %v272_v40 = vld [vmem:[%s2910_s30 + $0x48] sm:$0xff]  ;;  %v274_v42 = vld [vmem:[%s2910_s30 + $0x58] sm:$0xff] }
  0xa2   : > { %2049 = vmatprep.subr.bf16.mxu0 %v2048_v38  ;;  %v270_v38 = vld [vmem:[%s2910_s30 + $0x38] sm:$0xff]  ;;  %v273_v43 = vld [vmem:[%s2910_s30 + $0x50] sm:$0xff]  ;;  %v280_v48 = vld [vmem:[%s2910_s30 + $0x88] sm:$0xff] }
  0xa3   : > { %v278_v46 = vld [vmem:[%s2910_s30 + $0x78] sm:$0xff]  ;;  %v277_v47 = vld [vmem:[%s2910_s30 + $0x70] sm:$0xff]  ;;  %v279_v49 = vld [vmem:[%s2910_s30 + $0x80] sm:$0xff] }
  0xa4   : > { %v284_v52 = vld [vmem:[%s2910_s30 + $0xa8] sm:$0xff]  ;;  %v283_v53 = vld [vmem:[%s2910_s30 + $0xa0] sm:$0xff]  ;;  %v286_v54 = vld [vmem:[%s2910_s30 + $0xb8] sm:$0xff] }
  0xa5   : > { %2051 = vmatpush1.bf16.msra.mxu0 %v2050_v44  ;;  %v276_v44 = vld [vmem:[%s2910_s30 + $0x68] sm:$0xff]  ;;  %v285_v55 = vld [vmem:[%s2910_s30 + $0xb0] sm:$0xff]  ;;  %v290_v58 = vld [vmem:[%s2910_s30 + $0xd8] sm:$0xff] }
  0xa6   : > { %2053 = vmatprep.subr.bf16.mxu0 %v2052_v45  ;;  %v275_v45 = vld [vmem:[%s2910_s30 + $0x60] sm:$0xff]  ;;  %v289_v59 = vld [vmem:[%s2910_s30 + $0xd0] sm:$0xff]  ;;  %v292_v60 = vld [vmem:[%s2910_s30 + $0xe8] sm:$0xff] }
  0xa7   : > { %v291_v61 = vld [vmem:[%s2910_s30 + $0xe0] sm:$0xff] }
  0xa9   : > { %2055 = vmatpush1.bf16.msra.mxu0 %v2054_v50  ;;  %v282_v50 = vld [vmem:[%s2910_s30 + $0x98] sm:$0xff] }
  0xaa   : > { %2057 = vmatprep.subr.bf16.mxu0 %v2056_v51  ;;  %v281_v51 = vld [vmem:[%s2910_s30 + $0x90] sm:$0xff] }
  0xad   : > { %2059 = vmatpush1.bf16.msra.mxu0 %v2058_v56  ;;  %v288_v56 = vld [vmem:[%s2910_s30 + $0xc8] sm:$0xff] }
  0xae   : > { %2061 = vmatprep.subr.bf16.mxu0 %v2060_v57  ;;  %v287_v57 = vld [vmem:[%s2910_s30 + $0xc0] sm:$0xff] }
  0xb1   : > { %2063 = vmatpush1.bf16.msra.mxu0 %v2062_v62  ;;  %v294_v62 = vld [vmem:[%s2910_s30 + $0xf8] sm:$0xff] }
  0xb2   : > { %2065 = vmatprep.subr.bf16.mxu0 %v2064_v63  ;;  %v293_v63 = vld [vmem:[%s2910_s30 + $0xf0] sm:$0xff] }
  0xb5   : > { %2067 = vmatpush1.bf16.msra.mxu0 %v2066_v4 }
  0xb6   : > { %2069 = vmatprep.subr.bf16.mxu0 %v2068_v5 }
  0xb9   : > { %2071 = vmatpush1.bf16.msra.mxu0 %v2070_v10 }
  0xba   : > { %2073 = vmatprep.subr.bf16.mxu0 %v2072_v11 }
  0xbd   : > { %2075 = vmatpush1.bf16.msra.mxu0 %v2074_v16 }
  0xbe   : > { %2077 = vmatprep.subr.bf16.mxu0 %v2076_v17 }
  0xc1   : > { %2079 = vmatpush1.bf16.msra.mxu0 %v2078_v22 }
  0xc2   : > { %2081 = vmatprep.subr.bf16.mxu0 %v2080_v23 }
  0xc5   : > { %2083 = vmatpush1.bf16.msra.mxu0 %v2082_v28 }
  0xc6   : > { %2085 = vmatprep.subr.bf16.mxu0 %v2084_v29 }
  0xc9   : > { %2087 = vmatpush1.bf16.msra.mxu0 %v2086_v32 }
  0xcc   : > { %520 = vmatmul.mubr.f32.vlgmr.msra.gmra.mrb[0].mxu0 %v263_v33 }
  0xcd   : > { %525 = vmatprep.mubr.f32.mxu0 %v266_v34 }
  0xd0   : > { %526 = vmatmul.mubr.f32.gmra.mrb[2].mxu0 %v265_v35 }
  0xd1   : > { %531 = vmatprep.mubr.f32.mxu0 %v268_v36 }
  0xd4   : > { %532 = vmatmul.mubr.f32.gmra.mrb[4].mxu0 %v267_v37 }
  0xd5   : > { %537 = vmatprep.mubr.f32.mxu0 %v270_v38 }
  0xd8   : > { %538 = vmatmul.mubr.f32.gmra.mrb[6].mxu0 %v269_v39 }
  0xd9   : > { %543 = vmatprep.mubr.f32.mxu0 %v272_v40 }
  0xdc   : > { %544 = vmatmul.mubr.f32.gmra.mrb[8].mxu0 %v271_v41 }
  0xdd   : > { %549 = vmatprep.mubr.f32.mxu0 %v274_v42 }
  0xe0   : > { %550 = vmatmul.mubr.f32.gmra.mrb[10].mxu0 %v273_v43 }
  0xe1   : > { %555 = vmatprep.mubr.f32.mxu0 %v276_v44 }
  0xe4   : > { %556 = vmatmul.mubr.f32.gmra.mrb[12].mxu0 %v275_v45 }
  0xe5   : > { %561 = vmatprep.mubr.f32.mxu0 %v278_v46 }
  0xe8   : > { %562 = vmatmul.mubr.f32.gmra.mrb[14].mxu0 %v277_v47 }
  0xe9   : > { %567 = vmatprep.mubr.f32.mxu0 %v280_v48 }
  0xec   : > { %568 = vmatmul.mubr.f32.gmra.mrb[16].mxu0 %v279_v49 }
  0xed   : > { %573 = vmatprep.mubr.f32.mxu0 %v282_v50 }
  0xf0   : > { %574 = vmatmul.mubr.f32.gmra.mrb[18].mxu0 %v281_v51 }
  0xf1   : > { %579 = vmatprep.mubr.f32.mxu0 %v284_v52 }
  0xf4   : > { %580 = vmatmul.mubr.f32.gmra.mrb[20].mxu0 %v283_v53 }
  0xf5   : > { %585 = vmatprep.mubr.f32.mxu0 %v286_v54 }
  0xf8   : > { %586 = vmatmul.mubr.f32.gmra.mrb[22].mxu0 %v285_v55 }
  0xf9   : > { %591 = vmatprep.mubr.f32.mxu0 %v288_v56 }
  0xfc   : > { %592 = vmatmul.mubr.f32.gmra.mrb[24].mxu0 %v287_v57 }
  0xfd   : > { %597 = vmatprep.mubr.f32.mxu0 %v290_v58 }
 0x100   : > { %598 = vmatmul.mubr.f32.gmra.mrb[26].mxu0 %v289_v59 }
 0x101   : > { %603 = vmatprep.mubr.f32.mxu0 %v292_v60 }
 0x104   : > { %604 = vmatmul.mubr.f32.gmra.mrb[28].mxu0 %v291_v61 }
 0x105   : > { %609 = vmatprep.mubr.f32.mxu0 %v294_v62 }
 0x108   : > { %610 = vmatmul.mubr.f32.gmra.mrb[30].mxu0 %v293_v63 }
 0x19f   : > { %v2956_v0 = vpop.f32.mrb[0].mxu0 }
 0x1a0   : > { %v616_v1 = vmul.f32 %v2956_v0, %v2956_v0  ;;  %v2960_v2 = vpop.f32.mrb[1].mxu0 }
 0x1a1   : > { %v617_v3 = vmul.f32 %v2960_v2, %v2960_v2 }
 0x1a3   : > { %v2964_v4 = vpop.f32.mrb[2].mxu0  ;;  %v2966_v5 = vadd.f32 %v617_v3, %v616_v1 }
 0x1a4   : > { %v618_v6 = vmul.f32 %v2964_v4, %v2964_v4  ;;  %v2970_v7 = vpop.f32.mrb[3].mxu0 }
 0x1a5   : > { %v619_v8 = vmul.f32 %v2970_v7, %v2970_v7  ;;  %664 = vrot.lane.b32.xlu0 %v2966_v5, %s2675_s21 }
 0x1a7   : > { %v2976_v9 = vadd.f32 %v619_v8, %v618_v6  ;;  %v2978_v10 = vpop.f32.mrb[4].mxu0 }
 0x1a8   : > { %v620_v11 = vmul.f32 %v2978_v10, %v2978_v10  ;;  %v2982_v12 = vpop.f32.mrb[5].mxu0 }
 0x1a9   : > { %v621_v13 = vmul.f32 %v2982_v12, %v2982_v12  ;;  %666 = vrot.lane.b32.xlu0 %v2976_v9, %s2675_s21 }
 0x1ab   : > { %v2988_v14 = vpop.f32.mrb[6].mxu0  ;;  %v2990_v15 = vadd.f32 %v621_v13, %v620_v11  ;;  %v360_v13 = vld [vmem:[#allocation7 + $0x8] sm:$0xff] }
 0x1ac   : > { %v622_v16 = vmul.f32 %v2988_v14, %v2988_v14  ;;  %v2994_v17 = vpop.f32.mrb[7].mxu0 }
 0x1ad   : > { %v623_v18 = vmul.f32 %v2994_v17, %v2994_v17  ;;  %668 = vrot.lane.b32.xlu1 %v2990_v15, %s2675_s21 }
 0x1af   : > { %v3000_v19 = vadd.f32 %v623_v18, %v622_v16  ;;  %v3002_v20 = vpop.f32.mrb[8].mxu0  ;;  %v362_v16 = vld [vmem:[#allocation7 + $0x18] sm:$0xff]  ;;  %v359_v18 = vld [vmem:[#allocation7] sm:$0xff] }
 0x1b0   : > { %v624_v21 = vmul.f32 %v3002_v20, %v3002_v20  ;;  %v3006_v22 = vpop.f32.mrb[9].mxu0 }
 0x1b1   : > { %v625_v23 = vmul.f32 %v3006_v22, %v3006_v22  ;;  %670 = vrot.lane.b32.xlu1 %v3000_v19, %s2675_s21 }
 0x1b3   : > { %v3012_v24 = vadd.f32 %v625_v23, %v624_v21  ;;  %v3014_v25 = vpop.f32.mrb[10].mxu0 }
 0x1b4   : > { %v626_v26 = vmul.f32 %v3014_v25, %v3014_v25  ;;  %v3018_v27 = vpop.f32.mrb[11].mxu0 }
 0x1b5   : > { %v627_v28 = vmul.f32 %v3018_v27, %v3018_v27  ;;  %672 = vrot.lane.b32.xlu0 %v3012_v24, %s2675_s21 }
 0x1b7   : > { %v3024_v29 = vadd.f32 %v627_v28, %v626_v26  ;;  %v3026_v30 = vpop.f32.mrb[12].mxu0  ;;  %v2088_v26 = vpack.c.bf16 %v362_v16, %v360_v13  ;;  %v361_v28 = vld [vmem:[#allocation7 + $0x10] sm:$0xff] }
 0x1b8   : > { %v628_v31 = vmul.f32 %v3026_v30, %v3026_v30  ;;  %v3030_v32 = vpop.f32.mrb[13].mxu0  ;;  %v369_v13 = vld [vmem:[#allocation7 + $0x50] sm:$0xff] }
 0x1b9   : > { %v629_v33 = vmul.f32 %v3030_v32, %v3030_v32  ;;  %674 = vrot.lane.b32.xlu1 %v3024_v29, %s2675_s21  ;;  %2089 = vmatprep.subr.bf16.mxu1 %v2088_v26 }
 0x1bb   : > { %v3036_v34 = vadd.f32 %v629_v33, %v628_v31  ;;  %v3038_v35 = vpop.f32.mrb[14].mxu0  ;;  %v364_v31 = vld [vmem:[#allocation7 + $0x28] sm:$0xff]  ;;  %v366_v33 = vld [vmem:[#allocation7 + $0x38] sm:$0xff] }
 0x1bc   : > { %v630_v36 = vmul.f32 %v3038_v35, %v3038_v35  ;;  %v3042_v37 = vpop.f32.mrb[15].mxu0 }
 0x1bd   : > { %v631_v38 = vmul.f32 %v3042_v37, %v3042_v37  ;;  %676 = vrot.lane.b32.xlu0 %v3036_v34, %s2675_s21 }
 0x1bf   : > { %v3048_v39 = vadd.f32 %v631_v38, %v630_v36  ;;  %v3050_v40 = vpop.f32.mrb[16].mxu0 }
 0x1c0   : > { %v632_v41 = vmul.f32 %v3050_v40, %v3050_v40  ;;  %v3054_v42 = vpop.f32.mrb[17].mxu0 }
 0x1c1   : > { %v633_v43 = vmul.f32 %v3054_v42, %v3054_v42  ;;  %678 = vrot.lane.b32.xlu1 %v3048_v39, %s2675_s21 }
 0x1c3   : > { %v3060_v44 = vadd.f32 %v633_v43, %v632_v41  ;;  %v3062_v45 = vpop.f32.mrb[18].mxu0  ;;  %v2090_v41 = vpack.c.bf16 %v361_v28, %v359_v18  ;;  %v2092_v43 = vpack.c.bf16 %v366_v33, %v364_v31  ;;  %v372_v28 = vld [vmem:[#allocation7 + $0x68] sm:$0xff]  ;;  %v374_v31 = vld [vmem:[#allocation7 + $0x78] sm:$0xff] }
 0x1c4   : > { %v634_v46 = vmul.f32 %v3062_v45, %v3062_v45  ;;  %v3066_v47 = vpop.f32.mrb[19].mxu0 }
 0x1c5   : > { %v635_v48 = vmul.f32 %v3066_v47, %v3066_v47  ;;  %680 = vrot.lane.b32.xlu0 %v3060_v44, %s2675_s21  ;;  %2091 = vmatpush1.bf16.msra.mxu1 %v2090_v41  ;;  %v2100_v41 = vpack.c.bf16 %v374_v31, %v372_v28  ;;  %v381_v28 = vld [vmem:[#allocation7 + $0xb0] sm:$0xff] }
 0x1c6   : > { %2093 = vmatprep.subr.bf16.mxu1 %v2092_v43  ;;  %v371_v43 = vld [vmem:[#allocation7 + $0x60] sm:$0xff] }
 0x1c7   : > { %v3072_v49 = vadd.f32 %v635_v48, %v634_v46  ;;  %v3074_v50 = vpop.f32.mrb[20].mxu0  ;;  %v363_v46 = vld [vmem:[#allocation7 + $0x20] sm:$0xff]  ;;  %v365_v48 = vld [vmem:[#allocation7 + $0x30] sm:$0xff] }
 0x1c8   : > { %v636_v51 = vmul.f32 %v3074_v50, %v3074_v50  ;;  %v3078_v52 = vpop.f32.mrb[21].mxu0 }
 0x1c9   : > { %v637_v53 = vmul.f32 %v3078_v52, %v3078_v52  ;;  %682 = vrot.lane.b32.xlu1 %v3072_v49, %s2675_s21 }
 0x1cb   : > { %v3084_v54 = vadd.f32 %v637_v53, %v636_v51  ;;  %v3086_v55 = vpop.f32.mrb[22].mxu0  ;;  %v368_v51 = vld [vmem:[#allocation7 + $0x48] sm:$0xff] }
 0x1cc   : > { %v638_v56 = vmul.f32 %v3086_v55, %v3086_v55  ;;  %v3090_v57 = vpop.f32.mrb[23].mxu0 }
 0x1cd   : > { %v639_v58 = vmul.f32 %v3090_v57, %v3090_v57  ;;  %684 = vrot.lane.b32.xlu0 %v3084_v54, %s2675_s21 }
 0x1cf   : > { %v3096_v59 = vadd.f32 %v639_v58, %v638_v56  ;;  %v3098_v60 = vpop.f32.mrb[24].mxu0  ;;  %v370_v56 = vld [vmem:[#allocation7 + $0x58] sm:$0xff]  ;;  %v2094_v58 = vpack.c.bf16 %v365_v48, %v363_v46  ;;  %v373_v46 = vld [vmem:[#allocation7 + $0x70] sm:$0xff] }
 0x1d0   : > { %v640_v61 = vmul.f32 %v3098_v60, %v3098_v60  ;;  %v3102_v62 = vpop.f32.mrb[25].mxu0  ;;  %v2102_v48 = vpack.c.bf16 %v373_v46, %v371_v43  ;;  %v383_v43 = vld [vmem:[#allocation7 + $0xc0] sm:$0xff]  ;;  %v385_v46 = vld [vmem:[#allocation7 + $0xd0] sm:$0xff] }
 0x1d1   : > { %v641_v63 = vmul.f32 %v3102_v62, %v3102_v62  ;;  %686 = vrot.lane.b32.xlu1 %v3096_v59, %s2675_s21  ;;  %2095 = vmatpush1.bf16.msra.mxu1 %v2094_v58 }
 0x1d3   : > { %v3108_v1 = vadd.f32 %v641_v63, %v640_v61  ;;  %v3110_v3 = vpop.f32.mrb[26].mxu0 }
 0x1d4   : > { %v642_v6 = vmul.f32 %v3110_v3, %v3110_v3  ;;  %v3114_v8 = vpop.f32.mrb[27].mxu0 }
 0x1d5   : > { %v643_v11 = vmul.f32 %v3114_v8, %v3114_v8  ;;  %688 = vrot.lane.b32.xlu0 %v3108_v1, %s2675_s21 }
 0x1d7   : > { %v3120_v21 = vadd.f32 %v643_v11, %v642_v6  ;;  %v3122_v23 = vpop.f32.mrb[28].mxu0  ;;  %v2096_v6 = vpack.c.bf16 %v370_v56, %v368_v51  ;;  %v367_v11 = vld [vmem:[#allocation7 + $0x40] sm:$0xff]  ;;  %v376_v51 = vld [vmem:[#allocation7 + $0x88] sm:$0xff] }
 0x1d8   : > { %v644_v36 = vmul.f32 %v3122_v23, %v3122_v23  ;;  %v3126_v38 = vpop.f32.mrb[29].mxu0  ;;  %v2098_v33 = vpack.c.bf16 %v369_v13, %v367_v11  ;;  %v380_v11 = vld [vmem:[#allocation7 + $0xa8] sm:$0xff] }
 0x1d9   : > { %v645_v53 = vmul.f32 %v3126_v38, %v3126_v38  ;;  %690 = vrot.lane.b32.xlu1 %v3120_v21, %s2675_s21  ;;  %2097 = vmatprep.subr.bf16.mxu1 %v2096_v6  ;;  %v382_v6 = vld [vmem:[#allocation7 + $0xb8] sm:$0xff] }
 0x1da   : > { %2099 = vmatpush1.bf16.msra.mxu1 %v2098_v33  ;;  %v2108_v13 = vpack.c.bf16 %v382_v6, %v380_v11  ;;  %v386_v33 = vld [vmem:[#allocation7 + $0xd8] sm:$0xff]  ;;  %v389_v11 = vld [vmem:[#allocation7 + $0xf0] sm:$0xff] }
 0x1db   : > { %v3132_v61 = vadd.f32 %v645_v53, %v644_v36  ;;  %v3134_v63 = vpop.f32.mrb[30].mxu0  ;;  %2101 = vmatprep.subr.bf16.mxu1 %v2100_v41  ;;  %v378_v53 = vld [vmem:[#allocation7 + $0x98] sm:$0xff] }
 0x1dc   : > { %3969 = vst [vmem:[#allocation15_spill] sm:$0xff] %v3134_v63  ;;  %v646_v16 = vmul.f32 %v3134_v63, %v3134_v63  ;;  %v3138_v18 = vpop.f32.mrb[31].mxu0  ;;  %v2104_v56 = vpack.c.bf16 %v378_v53, %v376_v51  ;;  %v375_v63 = vld [vmem:[#allocation7 + $0x80] sm:$0xff]  ;;  %v390_v53 = vld [vmem:[#allocation7 + $0xf8] sm:$0xff] }
 0x1dd   : > { %3970 = vst [vmem:[#allocation16_spill] sm:$0xff] %v3138_v18  ;;  %v647_v26 = vmul.f32 %v3138_v18, %v3138_v18  ;;  %692 = vrot.lane.b32.xlu0 %v3132_v61, %s2675_s21  ;;  %v377_v18 = vld [vmem:[#allocation7 + $0x90] sm:$0xff] }
 0x1de   : > { %2103 = vmatpush1.bf16.msra.mxu1 %v2102_v48  ;;  %v2106_v58 = vpack.c.bf16 %v377_v18, %v375_v63  ;;  %v2114_v48 = vpack.c.bf16 %v385_v46, %v383_v43  ;;  %v388_v18 = vld [vmem:[#allocation7 + $0xe8] sm:$0xff] }
 0x1df   : > { %v3144_v36 = vadd.f32 %v647_v26, %v646_v16  ;;  %2105 = vmatprep.subr.bf16.mxu1 %v2104_v56  ;;  %v379_v16 = vld [vmem:[#allocation7 + $0xa0] sm:$0xff]  ;;  %v384_v26 = vld [vmem:[#allocation7 + $0xc8] sm:$0xff]  ;;  %v2116_v56 = vpack.c.bf16 %v390_v53, %v388_v18  ;;  %v397_v53 = vld [vmem:[#allocation7 + $0x130] sm:$0xff] }
 0x1e0   : > { %v2110_v31 = vpack.c.bf16 %v381_v28, %v379_v16  ;;  %v2112_v41 = vpack.c.bf16 %v386_v33, %v384_v26  ;;  %v392_v28 = vld [vmem:[#allocation7 + $0x108] sm:$0xff]  ;;  %v391_v26 = vld [vmem:[#allocation7 + $0x100] sm:$0xff]  ;;  %v393_v33 = vld [vmem:[#allocation7 + $0x110] sm:$0xff] }
 0x1e1   : > { %694 = vrot.lane.b32.xlu1 %v3144_v36, %s2675_s21  ;;  %v395_v18 = vld [vmem:[#allocation7 + $0x120] sm:$0xff] }
 0x1e2   : > { %2107 = vmatpush1.bf16.msra.mxu1 %v2106_v58  ;;  %v387_v58 = vld [vmem:[#allocation7 + $0xe0] sm:$0xff] }
 0x1e3   : > { %2109 = vmatprep.subr.bf16.mxu1 %v2108_v13  ;;  %v2118_v6 = vpack.c.bf16 %v389_v11, %v387_v58 }
 0x1e6   : > { %2111 = vmatpush1.bf16.msra.mxu1 %v2110_v31 }
 0x1e7   : > { %2113 = vmatprep.subr.bf16.mxu1 %v2112_v41  ;;  %v2122_v41 = vpack.c.bf16 %v393_v33, %v391_v26 }
 0x1ea   : > { %2115 = vmatpush1.bf16.msra.mxu1 %v2114_v48  ;;  %v396_v48 = vld [vmem:[#allocation7 + $0x128] sm:$0xff] }
 0x1eb   : > { %2117 = vmatprep.subr.bf16.mxu1 %v2116_v56  ;;  %v2126_v56 = vpack.c.bf16 %v397_v53, %v395_v18 }
 0x1ee   : > { %2119 = vmatpush1.bf16.msra.mxu1 %v2118_v6  ;;  %v400_v6 = vld [vmem:[#allocation7 + $0x148] sm:$0xff] }
 0x217   : > { %v665_v51 = vpop.permute.xlu0 %664 }
 0x218   : > { %v3149_v63 = vadd.f32 %v665_v51, %v2966_v5  ;;  %v394_v5 = vld [vmem:[#allocation7 + $0x118] sm:$0xff] }
 0x219   : > { %v2120_v31 = vpack.c.bf16 %v394_v5, %v392_v28  ;;  %v398_v51 = vld [vmem:[#allocation7 + $0x138] sm:$0xff]  ;;  %v399_v28 = vld [vmem:[#allocation7 + $0x140] sm:$0xff]  ;;  %v401_v5 = vld [vmem:[#allocation7 + $0x150] sm:$0xff] }
 0x21a   : > { %714 = vrot.lane.b32.xlu0 %v3149_v63, %s2676_s23 }
 0x21b   : > { %v667_v13 = vpop.permute.xlu0 %666  ;;  %2121 = vmatprep.subr.bf16.mxu1 %v2120_v31  ;;  %v2130_v31 = vpack.c.bf16 %v401_v5, %v399_v28 }
 0x21c   : > { %v3154_v16 = vadd.f32 %v667_v13, %v2976_v9  ;;  %2123 = vmatpush1.bf16.msra.mxu1 %v2122_v41  ;;  %v2124_v9 = vpack.c.bf16 %v398_v51, %v396_v48  ;;  %v402_v13 = vld [vmem:[#allocation7 + $0x158] sm:$0xff]  ;;  %v404_v41 = vld [vmem:[#allocation7 + $0x168] sm:$0xff]  ;;  %v403_v48 = vld [vmem:[#allocation7 + $0x160] sm:$0xff] }
 0x21d   : > { %v405_v51 = vld [vmem:[#allocation7 + $0x170] sm:$0xff] }
 0x21e   : > { %716 = vrot.lane.b32.xlu1 %v3154_v16, %s2676_s23  ;;  %2125 = vmatprep.subr.bf16.mxu1 %v2124_v9  ;;  %v2134_v9 = vpack.c.bf16 %v405_v51, %v403_v48 }
 0x21f   : > { %v669_v43 = vpop.permute.xlu1 %668 }
 0x220   : > { %v3159_v46 = vadd.f32 %v669_v43, %v2990_v15  ;;  %2127 = vmatpush1.bf16.msra.mxu1 %v2126_v56  ;;  %v2128_v15 = vpack.c.bf16 %v402_v13, %v400_v6  ;;  %v406_v43 = vld [vmem:[#allocation7 + $0x178] sm:$0xff]  ;;  %v408_v56 = vld [vmem:[#allocation7 + $0x188] sm:$0xff]  ;;  %v407_v6 = vld [vmem:[#allocation7 + $0x180] sm:$0xff] }
 0x221   : > { %v409_v13 = vld [vmem:[#allocation7 + $0x190] sm:$0xff] }
 0x222   : > { %718 = vrot.lane.b32.xlu0 %v3159_v46, %s2676_s23  ;;  %2129 = vmatprep.subr.bf16.mxu1 %v2128_v15  ;;  %v2138_v15 = vpack.c.bf16 %v409_v13, %v407_v6 }
 0x223   : > { %v671_v58 = vpop.permute.xlu1 %670 }
 0x224   : > { %v3164_v11 = vadd.f32 %v671_v58, %v3000_v19  ;;  %2131 = vmatpush1.bf16.msra.mxu1 %v2130_v31  ;;  %v2132_v19 = vpack.c.bf16 %v406_v43, %v404_v41  ;;  %v410_v58 = vld [vmem:[#allocation7 + $0x198] sm:$0xff]  ;;  %v412_v31 = vld [vmem:[#allocation7 + $0x1a8] sm:$0xff]  ;;  %v411_v41 = vld [vmem:[#allocation7 + $0x1a0] sm:$0xff] }
 0x225   : > { %v413_v43 = vld [vmem:[#allocation7 + $0x1b0] sm:$0xff] }
 0x226   : > { %720 = vrot.lane.b32.xlu1 %v3164_v11, %s2676_s23  ;;  %2133 = vmatprep.subr.bf16.mxu1 %v2132_v19  ;;  %v2142_v19 = vpack.c.bf16 %v413_v43, %v411_v41 }
 0x227   : > { %v673_v26 = vpop.permute.xlu0 %672 }
 0x228   : > { %v3169_v33 = vadd.f32 %v673_v26, %v3012_v24  ;;  %2135 = vmatpush1.bf16.msra.mxu1 %v2134_v9  ;;  %v2136_v24 = vpack.c.bf16 %v410_v58, %v408_v56  ;;  %v414_v26 = vld [vmem:[#allocation7 + $0x1b8] sm:$0xff]  ;;  %v416_v9 = vld [vmem:[#allocation7 + $0x1c8] sm:$0xff]  ;;  %v415_v56 = vld [vmem:[#allocation7 + $0x1c0] sm:$0xff] }
 0x229   : > { %v417_v58 = vld [vmem:[#allocation7 + $0x1d0] sm:$0xff] }
 0x22a   : > { %722 = vrot.lane.b32.xlu0 %v3169_v33, %s2676_s23  ;;  %2137 = vmatprep.subr.bf16.mxu1 %v2136_v24  ;;  %v2146_v24 = vpack.c.bf16 %v417_v58, %v415_v56 }
 0x22b   : > { %v675_v18 = vpop.permute.xlu1 %674 }
 0x22c   : > { %v3174_v53 = vadd.f32 %v675_v18, %v3024_v29  ;;  %2139 = vmatpush1.bf16.msra.mxu1 %v2138_v15  ;;  %v2140_v29 = vpack.c.bf16 %v414_v26, %v412_v31  ;;  %v418_v18 = vld [vmem:[#allocation7 + $0x1d8] sm:$0xff]  ;;  %v420_v15 = vld [vmem:[#allocation7 + $0x1e8] sm:$0xff]  ;;  %v419_v31 = vld [vmem:[#allocation7 + $0x1e0] sm:$0xff] }
 0x22d   : > { %v421_v26 = vld [vmem:[#allocation7 + $0x1f0] sm:$0xff] }
 0x22e   : > { %724 = vrot.lane.b32.xlu1 %v3174_v53, %s2676_s23  ;;  %2141 = vmatprep.subr.bf16.mxu1 %v2140_v29  ;;  %v2150_v29 = vpack.c.bf16 %v421_v26, %v419_v31 }
 0x22f   : > { %v677_v28 = vpop.permute.xlu0 %676 }
 0x230   : > { %v3179_v5 = vadd.f32 %v677_v28, %v3036_v34  ;;  %2143 = vmatpush1.bf16.msra.mxu1 %v2142_v19  ;;  %v2144_v34 = vpack.c.bf16 %v418_v18, %v416_v9  ;;  %v422_v28 = vld [vmem:[#allocation7 + $0x1f8] sm:$0xff] }
 0x232   : > { %726 = vrot.lane.b32.xlu0 %v3179_v5, %s2676_s23  ;;  %2145 = vmatprep.subr.bf16.mxu1 %v2144_v34 }
 0x233   : > { %v679_v48 = vpop.permute.xlu1 %678 }
 0x234   : > { %v3184_v51 = vadd.f32 %v679_v48, %v3048_v39  ;;  %2147 = vmatpush1.bf16.msra.mxu1 %v2146_v24  ;;  %v2148_v39 = vpack.c.bf16 %v422_v28, %v420_v15 }
 0x236   : > { %728 = vrot.lane.b32.xlu1 %v3184_v51, %s2676_s23  ;;  %2149 = vmatprep.subr.bf16.mxu1 %v2148_v39 }
 0x237   : > { %v681_v6 = vpop.permute.xlu0 %680 }
 0x238   : > { %v3189_v13 = vadd.f32 %v681_v6, %v3060_v44  ;;  %2151 = vmatpush1.bf16.msra.mxu1 %v2150_v29 }
 0x23a   : > { %730 = vrot.lane.b32.xlu0 %v3189_v13, %s2676_s23 }
 0x23b   : > { %v683_v41 = vpop.permute.xlu1 %682 }
 0x23c   : > { %v3194_v43 = vadd.f32 %v683_v41, %v3072_v49 }
 0x23e   : > { %732 = vrot.lane.b32.xlu1 %v3194_v43, %s2676_s23 }
 0x23f   : > { %v685_v44 = vpop.permute.xlu0 %684 }
 0x240   : > { %v3199_v19 = vadd.f32 %v685_v44, %v3084_v54 }
 0x242   : > { %734 = vrot.lane.b32.xlu0 %v3199_v19, %s2676_s23 }
 0x243   : > { %v687_v48 = vpop.permute.xlu1 %686 }
 0x244   : > { %v3204_v9 = vadd.f32 %v687_v48, %v3096_v59 }
 0x246   : > { %736 = vrot.lane.b32.xlu1 %v3204_v9, %s2676_s23 }
 0x247   : > { %v689_v49 = vpop.permute.xlu0 %688 }
 0x248   : > { %v3209_v18 = vadd.f32 %v689_v49, %v3108_v1 }
 0x24a   : > { %738 = vrot.lane.b32.xlu0 %v3209_v18, %s2676_s23 }
 0x24b   : > { %v691_v34 = vpop.permute.xlu1 %690 }
 0x24c   : > { %v3214_v54 = vadd.f32 %v691_v34, %v3120_v21 }
 0x24e   : > { %740 = vrot.lane.b32.xlu1 %v3214_v54, %s2676_s23 }
 0x24f   : > { %v693_v56 = vpop.permute.xlu0 %692 }
 0x250   : > { %v3219_v59 = vadd.f32 %v693_v56, %v3132_v61 }
 0x252   : > { %742 = vrot.lane.b32.xlu0 %v3219_v59, %s2676_s23 }
 0x253   : > { %v695_v58 = vpop.permute.xlu1 %694 }
 0x254   : > { %v3224_v1 = vadd.f32 %v695_v58, %v3144_v36 }
 0x256   : > { %744 = vrot.lane.b32.xlu1 %v3224_v1, %s2676_s23 }
 0x28c   : > { %v715_v24 = vpop.permute.xlu0 %714 }
 0x28d   : > { %v746_v21 = vadd.f32 %v715_v24, %v3149_v63 }
 0x28f   : > { %v762_v6 = vadd.f32 1e-06, %v746_v21 }
 0x290   : > { %v717_v15 = vpop.permute.xlu1 %716 }
 0x291   : > { %2285 = vrsqrt.f32 %v762_v6  ;;  %v747_v28 = vadd.f32 %v717_v15, %v3154_v16  ;;  %vm780_vm0 = vcmp.eq.f32.partialorder %v762_v6, inf  ;;  %v783_v34 = vand.u32 2147483648, %v762_v6 }
 0x292   : > { %vm782_vm1 = vcmp.eq.f32.partialorder %v762_v6, 0.0 }
 0x293   : > { %v763_v61 = vadd.f32 1e-06, %v747_v28 }
 0x294   : > { %v719_v39 = vpop.permute.xlu0 %718 }
 0x295   : > { %2287 = vrsqrt.f32 %v763_v61  ;;  %v748_v31 = vadd.f32 %v719_v39, %v3159_v46  ;;  %vm787_vm2 = vcmp.eq.f32.partialorder %v763_v61, inf  ;;  %v790_v28 = vand.u32 2147483648, %v763_v61 }
 0x296   : > { %vm789_vm3 = vcmp.eq.f32.partialorder %v763_v61, 0.0 }
 0x297   : > { %v764_v26 = vadd.f32 1e-06, %v748_v31 }
 0x298   : > { %v721_v29 = vpop.permute.xlu1 %720 }
 0x299   : > { %2289 = vrsqrt.f32 %v764_v26  ;;  %v749_v36 = vadd.f32 %v721_v29, %v3164_v11  ;;  %vm794_vm4 = vcmp.eq.f32.partialorder %v764_v26, inf  ;;  %vm796_vm5 = vcmp.eq.f32.partialorder %v764_v26, 0.0 }
 0x29b   : > { %v2286_v41 = vpop.eup %2285  ;;  %v765_v44 = vadd.f32 1e-06, %v749_v36 }
 0x29c   : > { %v723_v48 = vpop.permute.xlu0 %722  ;;  %v779_v49 = vmul.f32 %v2286_v41, %v762_v6 }
 0x29d   : > { %2291 = vrsqrt.f32 %v765_v44  ;;  %v750_v63 = vadd.f32 %v723_v48, %v3169_v33  ;;  %vm801_vm6 = vcmp.eq.f32.partialorder %v765_v44, inf  ;;  %vm803_vm7 = vcmp.eq.f32.partialorder %v765_v44, 0.0 }
 0x29e   : > { %v781_v16 = vsel %vm780_vm0, %v762_v6, %v779_v49  ;;  %v797_v49 = vand.u32 2147483648, %v764_v26 }
 0x29f   : > { %v2288_v56 = vpop.eup %2287  ;;  %v766_v58 = vadd.f32 1e-06, %v750_v63  ;;  %v3233_v24 = vsel %vm782_vm1, %v783_v34, %v781_v16 }
 0x2a0   : > { %v725_v46 = vpop.permute.xlu1 %724  ;;  %v1904_v21 = vmul.f32 -1.442695, %v3233_v24  ;;  %v786_v15 = vmul.f32 %v2288_v56, %v763_v61 }
 0x2a1   : > { %2293 = vrsqrt.f32 %v766_v58  ;;  %v751_v11 = vadd.f32 %v725_v46, %v3174_v53  ;;  %vm808_vm8 = vcmp.eq.f32.partialorder %v766_v58, inf  ;;  %vm810_vm9 = vcmp.eq.f32.partialorder %v766_v58, 0.0 }
 0x2a2   : > { %2295 = vpow2.f32 %v1904_v21  ;;  %v788_v39 = vsel %vm787_vm2, %v763_v61, %v786_v15 }
 0x2a3   : > { %v2290_v33 = vpop.eup %2289  ;;  %v767_v31 = vadd.f32 1e-06, %v751_v11  ;;  %v3237_v29 = vsel %vm789_vm3, %v790_v28, %v788_v39 }
 0x2a4   : > { %v727_v6 = vpop.permute.xlu0 %726  ;;  %v1905_v36 = vmul.f32 -1.442695, %v3237_v29  ;;  %v793_v41 = vmul.f32 %v2290_v33, %v764_v26 }
 0x2a5   : > { %2297 = vrsqrt.f32 %v767_v31  ;;  %v752_v48 = vadd.f32 %v727_v6, %v3179_v5  ;;  %v804_v5 = vand.u32 2147483648, %v765_v44  ;;  %vm815_vm10 = vcmp.eq.f32.partialorder %v767_v31, inf }
 0x2a6   : > { %2299 = vpow2.f32 %v1905_v36  ;;  %v795_v53 = vsel %vm794_vm4, %v764_v26, %v793_v41  ;;  %vm817_vm11 = vcmp.eq.f32.partialorder %v767_v31, 0.0 }
 0x2a7   : > { %v2292_v63 = vpop.eup %2291  ;;  %v3241_v34 = vadd.f32 1e-06, %v752_v48  ;;  %v3243_v61 = vsel %vm796_vm5, %v797_v49, %v795_v53  ;;  %v811_v48 = vand.u32 2147483648, %v766_v58 }
 0x2a8   : > { %v729_v16 = vpop.permute.xlu1 %728  ;;  %v1906_v56 = vmul.f32 -1.442695, %v3243_v61  ;;  %v800_v46 = vmul.f32 %v2292_v63, %v765_v44 }
 0x2a9   : > { %2301 = vrsqrt.f32 %v3241_v34  ;;  %v753_v21 = vadd.f32 %v729_v16, %v3184_v51  ;;  %vm822_vm12 = vcmp.eq.f32.partialorder %v3241_v34, inf  ;;  %vm824_vm13 = vcmp.eq.f32.partialorder %v3241_v34, 0.0 }
 0x2aa   : > { %2303 = vpow2.f32 %v1906_v56  ;;  %v802_v15 = vsel %vm801_vm6, %v765_v44, %v800_v46 }
 0x2ab   : > { %v2294_v11 = vpop.eup %2293  ;;  %v3248_v26 = vadd.f32 1e-06, %v753_v21  ;;  %v3250_v28 = vsel %vm803_vm7, %v804_v5, %v802_v15  ;;  %v818_v15 = vand.u32 2147483648, %v767_v31 }
 0x2ac   : > { %v2296_v39 = vpop.eup %2295  ;;  %v731_v33 = vpop.permute.xlu0 %730  ;;  %v1907_v6 = vmul.f32 -1.442695, %v3250_v28  ;;  %v807_v36 = vmul.f32 %v2294_v11, %v766_v58 }
 0x2ad   : > { %2305 = vrsqrt.f32 %v3248_v26  ;;  %v754_v51 = vadd.f32 %v731_v33, %v3189_v13  ;;  %v938_v41 = vadd.f32 1.0, %v2296_v39  ;;  %vm829_vm14 = vcmp.eq.f32.partialorder %v3248_v26, inf }
 0x2ae   : > { %2307 = vpow2.f32 %v1907_v6  ;;  %v809_v49 = vsel %vm808_vm8, %v766_v58, %v807_v36  ;;  %vm831_vm15 = vcmp.eq.f32.partialorder %v3248_v26, 0.0 }
 0x2af   : > { %v2298_v44 = vpop.eup %2297  ;;  %v3255_v53 = vadd.f32 1e-06, %v754_v51  ;;  %2309 = vrcp.f32 %v938_v41  ;;  %v3257_v63 = vsel %vm810_vm9, %v811_v48, %v809_v49 }
 0x2b0   : > { %v2300_v16 = vpop.eup %2299  ;;  %v733_v56 = vpop.permute.xlu1 %732  ;;  %v1908_v46 = vmul.f32 -1.442695, %v3257_v63  ;;  %v814_v21 = vmul.f32 %v2298_v44, %v767_v31 }
 0x2b1   : > { %2311 = vrsqrt.f32 %v3255_v53  ;;  %v755_v13 = vadd.f32 %v733_v56, %v3194_v43  ;;  %v939_v5 = vadd.f32 1.0, %v2300_v16  ;;  %vm836_vm0 = vcmp.eq.f32.partialorder %v3255_v53, inf }
 0x2b2   : > { %2313 = vpow2.f32 %v1908_v46  ;;  %v816_v58 = vsel %vm815_vm10, %v767_v31, %v814_v21  ;;  %v825_v31 = vand.u32 2147483648, %v3241_v34  ;;  %vm838_vm1 = vcmp.eq.f32.partialorder %v3255_v53, 0.0 }
 0x2b3   : > { %v2302_v11 = vpop.eup %2301  ;;  %v3262_v39 = vadd.f32 1e-06, %v755_v13  ;;  %2315 = vrcp.f32 %v939_v5  ;;  %v3264_v33 = vsel %vm817_vm11, %v818_v15, %v816_v58  ;;  %v832_v58 = vand.u32 2147483648, %v3248_v26 }
 0x2b4   : > { %v2304_v6 = vpop.eup %2303  ;;  %v735_v36 = vpop.permute.xlu0 %734  ;;  %v1909_v51 = vmul.f32 -1.442695, %v3264_v33  ;;  %v821_v41 = vmul.f32 %v2302_v11, %v3241_v34 }
 0x2b5   : > { %2317 = vrsqrt.f32 %v3262_v39  ;;  %v756_v43 = vadd.f32 %v735_v36, %v3199_v19  ;;  %v940_v48 = vadd.f32 1.0, %v2304_v6  ;;  %vm843_vm2 = vcmp.eq.f32.partialorder %v3262_v39, inf }
 0x2b6   : > { %2319 = vpow2.f32 %v1909_v51  ;;  %v823_v49 = vsel %vm822_vm12, %v3241_v34, %v821_v41  ;;  %vm845_vm3 = vcmp.eq.f32.partialorder %v3262_v39, 0.0 }
 0x2b7   : > { %v2306_v44 = vpop.eup %2305  ;;  %v3274_v16 = vadd.f32 1e-06, %v756_v43  ;;  %2321 = vrcp.f32 %v940_v48  ;;  %v3276_v56 = vsel %vm824_vm13, %v825_v31, %v823_v49 }
 0x2b8   : > { %v2308_v46 = vpop.eup %2307  ;;  %v737_v21 = vpop.permute.xlu1 %736  ;;  %v1910_v13 = vmul.f32 -1.442695, %v3276_v56  ;;  %v828_v19 = vmul.f32 %v2306_v44, %v3248_v26 }
 0x2b9   : > { %v2310_v5 = vpop.eup %2309  ;;  %2323 = vrsqrt.f32 %v3274_v16  ;;  %v757_v15 = vadd.f32 %v737_v21, %v3204_v9  ;;  %v941_v34 = vadd.f32 1.0, %v2308_v46  ;;  %v839_v21 = vand.u32 2147483648, %v3255_v53 }
 0x2ba   : > { %v986_v11 = vmul.f32 %v2310_v5, %v3233_v24  ;;  %2325 = vpow2.f32 %v1910_v13  ;;  %v830_v6 = vsel %vm829_vm14, %v3248_v26, %v828_v19  ;;  %vm850_vm4 = vcmp.eq.f32.partialorder %v3274_v16, inf }
 0x2bb   : > { %v2312_v36 = vpop.eup %2311  ;;  %v3287_v51 = vadd.f32 1e-06, %v757_v15  ;;  %2327 = vrcp.f32 %v941_v34  ;;  %v3289_v41 = vsel %vm831_vm15, %v832_v58, %v830_v6  ;;  %vm852_vm5 = vcmp.eq.f32.partialorder %v3274_v16, 0.0 }
 0x2bc   : > { %v2314_v43 = vpop.eup %2313  ;;  %v739_v9 = vpop.permute.xlu0 %738  ;;  %v1003_v48 = vmul.f32 %v986_v11, %v2960_v2  ;;  %v1002_v31 = vmul.f32 %v986_v11, %v2956_v0  ;;  %v1911_v24 = vmul.f32 -1.442695, %v3289_v41  ;;  %v835_v49 = vmul.f32 %v2312_v36, %v3255_v53 }
 0x2bd   : > { %v2316_v44 = vpop.eup %2315  ;;  %2329 = vrsqrt.f32 %v3287_v51  ;;  %v758_v26 = vadd.f32 %v739_v9, %v3209_v18  ;;  %v942_v46 = vadd.f32 1.0, %v2314_v43  ;;  %v846_v43 = vand.u32 2147483648, %v3262_v39 }
 0x2be   : > { %1098 = vmatprep.mubr.f32.mxu1 %v1003_v48  ;;  %v987_v13 = vmul.f32 %v2316_v44, %v3237_v29  ;;  %2331 = vpow2.f32 %v1911_v24  ;;  %v837_v2 = vsel %vm836_vm0, %v3255_v53, %v835_v49  ;;  %vm857_vm6 = vcmp.eq.f32.partialorder %v3287_v51, inf }
 0x2bf   : > { %v2318_v0 = vpop.eup %2317  ;;  %v3302_v19 = vadd.f32 1e-06, %v758_v26  ;;  %1099 = vmatmul.mubr.f32.vlgmr.msra.gmra.mrb[0].mxu1 %v1002_v31  ;;  %2333 = vrcp.f32 %v942_v46  ;;  %v3304_v5 = vsel %vm838_vm1, %v839_v21, %v837_v2  ;;  %vm859_vm7 = vcmp.eq.f32.partialorder %v3287_v51, 0.0 }
 0x2c0   : > { %v2320_v18 = vpop.eup %2319  ;;  %v741_v15 = vpop.permute.xlu1 %740  ;;  %v1005_v34 = vmul.f32 %v987_v13, %v2970_v7  ;;  %v1004_v29 = vmul.f32 %v987_v13, %v2964_v4  ;;  %v1912_v58 = vmul.f32 -1.442695, %v3304_v5  ;;  %v842_v11 = vmul.f32 %v2318_v0, %v3262_v39 }
 0x2c1   : > { %v2322_v53 = vpop.eup %2321  ;;  %2335 = vrsqrt.f32 %v3302_v19  ;;  %v759_v6 = vadd.f32 %v741_v15, %v3214_v54  ;;  %v943_v36 = vadd.f32 1.0, %v2320_v18  ;;  %v853_v13 = vand.u32 2147483648, %v3274_v16 }
 0x2c2   : > { %1104 = vmatprep.mubr.f32.mxu1 %v1005_v34  ;;  %v988_v9 = vmul.f32 %v2322_v53, %v3243_v61  ;;  %2337 = vpow2.f32 %v1912_v58  ;;  %v844_v7 = vsel %vm843_vm2, %v3262_v39, %v842_v11  ;;  %vm864_vm8 = vcmp.eq.f32.partialorder %v3302_v19, inf }
 0x2c3   : > { %v2324_v4 = vpop.eup %2323  ;;  %v3317_v48 = vadd.f32 1e-06, %v759_v6  ;;  %1105 = vmatmul.mubr.f32.gmra.mrb[2].mxu1 %v1004_v29  ;;  %2339 = vrcp.f32 %v943_v36  ;;  %v3319_v31 = vsel %vm845_vm3, %v846_v43, %v844_v7  ;;  %v860_v6 = vand.u32 2147483648, %v3287_v51 }
 0x2c4   : > { %v2326_v54 = vpop.eup %2325  ;;  %v743_v24 = vpop.permute.xlu0 %742  ;;  %v1007_v49 = vmul.f32 %v988_v9, %v2982_v12  ;;  %v1006_v61 = vmul.f32 %v988_v9, %v2978_v10  ;;  %v1913_v44 = vmul.f32 -1.442695, %v3319_v31  ;;  %v849_v26 = vmul.f32 %v2324_v4, %v3274_v16 }
 0x2c5   : > { %v2328_v39 = vpop.eup %2327  ;;  %2341 = vrsqrt.f32 %v3317_v48  ;;  %v760_v46 = vadd.f32 %v743_v24, %v3219_v59  ;;  %v944_v21 = vadd.f32 1.0, %v2326_v54  ;;  %vm866_vm9 = vcmp.eq.f32.partialorder %v3302_v19, 0.0 }
 0x2c6   : > { %1110 = vmatprep.mubr.f32.mxu1 %v1007_v49  ;;  %v989_v2 = vmul.f32 %v2328_v39, %v3250_v28  ;;  %2343 = vpow2.f32 %v1913_v44  ;;  %v851_v12 = vsel %vm850_vm4, %v3274_v16, %v849_v26  ;;  %v867_v49 = vand.u32 2147483648, %v3302_v19 }
 0x2c7   : > { %v2330_v10 = vpop.eup %2329  ;;  %v3332_v0 = vadd.f32 1e-06, %v760_v46  ;;  %1111 = vmatmul.mubr.f32.gmra.mrb[4].mxu1 %v1006_v61  ;;  %2345 = vrcp.f32 %v944_v21  ;;  %v3334_v18 = vsel %vm852_vm5, %v853_v13, %v851_v12  ;;  %vm871_vm10 = vcmp.eq.f32.partialorder %v3317_v48, inf }
 0x2c8   : > { %v2332_v59 = vpop.eup %2331  ;;  %v745_v15 = vpop.permute.xlu1 %744  ;;  %v1009_v34 = vmul.f32 %v989_v2, %v2994_v17  ;;  %v1008_v28 = vmul.f32 %v989_v2, %v2988_v14  ;;  %v1914_v29 = vmul.f32 -1.442695, %v3334_v18  ;;  %v856_v58 = vmul.f32 %v2330_v10, %v3287_v51 }
 0x2c9   : > { %v2334_v16 = vpop.eup %2333  ;;  %2347 = vrsqrt.f32 %v3332_v0  ;;  %v761_v11 = vadd.f32 %v745_v15, %v3224_v1  ;;  %v945_v53 = vadd.f32 1.0, %v2332_v59  ;;  %vm873_vm11 = vcmp.eq.f32.partialorder %v3317_v48, 0.0 }
 0x2ca   : > { %1116 = vmatprep.mubr.f32.mxu1 %v1009_v34  ;;  %v990_v36 = vmul.f32 %v2334_v16, %v3257_v63  ;;  %2349 = vpow2.f32 %v1914_v29  ;;  %v858_v17 = vsel %vm857_vm6, %v3287_v51, %v856_v58  ;;  %vm878_vm12 = vcmp.eq.f32.partialorder %v3332_v0, inf }
 0x2cb   : > { %v2336_v14 = vpop.eup %2335  ;;  %v3347_v43 = vadd.f32 1e-06, %v761_v11  ;;  %1117 = vmatmul.mubr.f32.gmra.mrb[6].mxu1 %v1008_v28  ;;  %2351 = vrcp.f32 %v945_v53  ;;  %v3349_v9 = vsel %vm859_vm7, %v860_v6, %v858_v17  ;;  %vm880_vm13 = vcmp.eq.f32.partialorder %v3332_v0, 0.0 }
 0x2cc   : > { %v2338_v7 = vpop.eup %2337  ;;  %v1011_v1 = vmul.f32 %v990_v36, %v3006_v22  ;;  %v1010_v4 = vmul.f32 %v990_v36, %v3002_v20  ;;  %v1915_v54 = vmul.f32 -1.442695, %v3349_v9  ;;  %v863_v63 = vmul.f32 %v2336_v14, %v3302_v19 }
 0x2cd   : > { %v2340_v24 = vpop.eup %2339  ;;  %2353 = vrsqrt.f32 %v3347_v43  ;;  %v946_v51 = vadd.f32 1.0, %v2338_v7  ;;  %vm885_vm14 = vcmp.eq.f32.partialorder %v3347_v43, inf  ;;  %vm887_vm15 = vcmp.eq.f32.partialorder %v3347_v43, 0.0 }
 0x2ce   : > { %1122 = vmatprep.mubr.f32.mxu1 %v1011_v1  ;;  %v991_v61 = vmul.f32 %v2340_v24, %v3264_v33  ;;  %2355 = vpow2.f32 %v1915_v54  ;;  %v865_v22 = vsel %vm864_vm8, %v3302_v19, %v863_v63  ;;  %v874_v19 = vand.u32 2147483648, %v3317_v48 }
 0x2cf   : > { %v2342_v20 = vpop.eup %2341  ;;  %1123 = vmatmul.mubr.f32.gmra.mrb[8].mxu1 %v1010_v4  ;;  %2357 = vrcp.f32 %v946_v51  ;;  %v3361_v44 = vsel %vm866_vm9, %v867_v49, %v865_v22 }
 0x2d0   : > { %v2344_v26 = vpop.eup %2343  ;;  %v1013_v39 = vmul.f32 %v991_v61, %v3018_v27  ;;  %v1012_v46 = vmul.f32 %v991_v61, %v3014_v25  ;;  %v1916_v21 = vmul.f32 -1.442695, %v3361_v44  ;;  %v870_v13 = vmul.f32 %v2342_v20, %v3317_v48 }
 0x2d1   : > { %v2346_v33 = vpop.eup %2345  ;;  %v947_v2 = vadd.f32 1.0, %v2344_v26 }
 0x2d2   : > { %1128 = vmatprep.mubr.f32.mxu1 %v1013_v39  ;;  %v992_v12 = vmul.f32 %v2346_v33, %v3276_v56  ;;  %2359 = vpow2.f32 %v1916_v21  ;;  %v872_v10 = vsel %vm871_vm10, %v3317_v48, %v870_v13  ;;  %v881_v48 = vand.u32 2147483648, %v3332_v0 }
 0x2d3   : > { %v2348_v27 = vpop.eup %2347  ;;  %1129 = vmatmul.mubr.f32.gmra.mrb[10].mxu1 %v1012_v46  ;;  %2361 = vrcp.f32 %v947_v2  ;;  %v3372_v25 = vsel %vm873_vm11, %v874_v19, %v872_v10 }
 0x2d4   : > { %v2350_v59 = vpop.eup %2349  ;;  %v1015_v15 = vmul.f32 %v992_v12, %v3030_v32  ;;  %v1014_v34 = vmul.f32 %v992_v12, %v3026_v30  ;;  %v1917_v28 = vmul.f32 -1.442695, %v3372_v25  ;;  %v877_v29 = vmul.f32 %v2348_v27, %v3332_v0 }
 0x2d5   : > { %v2352_v56 = vpop.eup %2351  ;;  %v948_v58 = vadd.f32 1.0, %v2350_v59 }
 0x2d6   : > { %1134 = vmatprep.mubr.f32.mxu1 %v1015_v15  ;;  %v993_v16 = vmul.f32 %v2352_v56, %v3289_v41  ;;  %2363 = vpow2.f32 %v1917_v28  ;;  %v879_v11 = vsel %vm878_vm12, %v3332_v0, %v877_v29  ;;  %v888_v0 = vand.u32 2147483648, %v3347_v43  ;;  %v3971_v15 = vld [vmem:[#allocation16_spill] sm:$0xff] }
 0x2d7   : > { %v2354_v32 = vpop.eup %2353  ;;  %1135 = vmatmul.mubr.f32.gmra.mrb[12].mxu1 %v1014_v34  ;;  %2365 = vrcp.f32 %v948_v58  ;;  %v3383_v30 = vsel %vm880_vm13, %v881_v48, %v879_v11  ;;  %v3972_v34 = vld [vmem:[#allocation15_spill] sm:$0xff] }
 0x2d8   : > { %v2356_v53 = vpop.eup %2355  ;;  %v1017_v6 = vmul.f32 %v993_v16, %v3042_v37  ;;  %v1016_v36 = vmul.f32 %v993_v16, %v3038_v35  ;;  %v1918_v17 = vmul.f32 -1.442695, %v3383_v30  ;;  %v884_v14 = vmul.f32 %v2354_v32, %v3347_v43 }
 0x2d9   : > { %v2358_v41 = vpop.eup %2357  ;;  %v949_v7 = vadd.f32 1.0, %v2356_v53 }
 0x2da   : > { %1140 = vmatprep.mubr.f32.mxu1 %v1017_v6  ;;  %v994_v1 = vmul.f32 %v2358_v41, %v3304_v5  ;;  %2367 = vpow2.f32 %v1918_v17  ;;  %v886_v4 = vsel %vm885_vm14, %v3347_v43, %v884_v14 }
 0x2db   : > { %1141 = vmatmul.mubr.f32.gmra.mrb[14].mxu1 %v1016_v36  ;;  %2369 = vrcp.f32 %v949_v7  ;;  %v889_v35 = vsel %vm887_vm15, %v888_v0, %v886_v4 }
 0x2dc   : > { %v2360_v37 = vpop.eup %2359  ;;  %v1019_v54 = vmul.f32 %v994_v1, %v3054_v42  ;;  %v1018_v63 = vmul.f32 %v994_v1, %v3050_v40  ;;  %v1919_v24 = vmul.f32 -1.442695, %v889_v35 }
 0x2dd   : > { %v2362_v51 = vpop.eup %2361  ;;  %v950_v49 = vadd.f32 1.0, %v2360_v37 }
 0x2de   : > { %1146 = vmatprep.mubr.f32.mxu1 %v1019_v54  ;;  %v995_v61 = vmul.f32 %v2362_v51, %v3319_v31  ;;  %2371 = vpow2.f32 %v1919_v24 }
 0x2df   : > { %1147 = vmatmul.mubr.f32.gmra.mrb[16].mxu1 %v1018_v63  ;;  %2373 = vrcp.f32 %v950_v49 }
 0x2e0   : > { %v2364_v5 = vpop.eup %2363  ;;  %v1021_v43 = vmul.f32 %v995_v61, %v3066_v47  ;;  %v1020_v22 = vmul.f32 %v995_v61, %v3062_v45 }
 0x2e1   : > { %v2366_v20 = vpop.eup %2365  ;;  %v951_v26 = vadd.f32 1.0, %v2364_v5 }
 0x2e2   : > { %1152 = vmatprep.mubr.f32.mxu1 %v1021_v43  ;;  %v996_v42 = vmul.f32 %v2366_v20, %v3334_v18 }
 0x2e3   : > { %1153 = vmatmul.mubr.f32.gmra.mrb[18].mxu1 %v1020_v22  ;;  %2375 = vrcp.f32 %v951_v26 }
 0x2e4   : > { %v2368_v40 = vpop.eup %2367  ;;  %v1023_v39 = vmul.f32 %v996_v42, %v3078_v52  ;;  %v1022_v31 = vmul.f32 %v996_v42, %v3074_v50 }
 0x2e5   : > { %v2370_v46 = vpop.eup %2369  ;;  %v952_v21 = vadd.f32 1.0, %v2368_v40 }
 0x2e6   : > { %1158 = vmatprep.mubr.f32.mxu1 %v1023_v39  ;;  %v997_v13 = vmul.f32 %v2370_v46, %v3349_v9 }
 0x2e7   : > { %1159 = vmatmul.mubr.f32.gmra.mrb[20].mxu1 %v1022_v31  ;;  %2377 = vrcp.f32 %v952_v21 }
 0x2e8   : > { %v2372_v45 = vpop.eup %2371  ;;  %v1025_v47 = vmul.f32 %v997_v13, %v3090_v57  ;;  %v1024_v33 = vmul.f32 %v997_v13, %v3086_v55 }
 0x2e9   : > { %v2374_v18 = vpop.eup %2373  ;;  %v953_v2 = vadd.f32 1.0, %v2372_v45 }
 0x2ea   : > { %1164 = vmatprep.mubr.f32.mxu1 %v1025_v47  ;;  %v998_v19 = vmul.f32 %v2374_v18, %v3361_v44 }
 0x2eb   : > { %1165 = vmatmul.mubr.f32.gmra.mrb[22].mxu1 %v1024_v33  ;;  %2379 = vrcp.f32 %v953_v2 }
 0x2ec   : > { %v1027_v50 = vmul.f32 %v998_v19, %v3102_v62  ;;  %v1026_v52 = vmul.f32 %v998_v19, %v3098_v60 }
 0x2ed   : > { %v2376_v12 = vpop.eup %2375 }
 0x2ee   : > { %1170 = vmatprep.mubr.f32.mxu1 %v1027_v50  ;;  %v999_v9 = vmul.f32 %v2376_v12, %v3372_v25 }
 0x2ef   : > { %1171 = vmatmul.mubr.f32.gmra.mrb[24].mxu1 %v1026_v52 }
 0x2f0   : > { %v1029_v57 = vmul.f32 %v999_v9, %v3114_v8  ;;  %v1028_v55 = vmul.f32 %v999_v9, %v3110_v3 }
 0x2f1   : > { %v2378_v10 = vpop.eup %2377 }
 0x2f2   : > { %1176 = vmatprep.mubr.f32.mxu1 %v1029_v57  ;;  %v1000_v27 = vmul.f32 %v2378_v10, %v3383_v30 }
 0x2f3   : > { %1177 = vmatmul.mubr.f32.gmra.mrb[26].mxu1 %v1028_v55 }
 0x2f4   : > { %v1031_v44 = vmul.f32 %v1000_v27, %v3126_v38  ;;  %v1030_v62 = vmul.f32 %v1000_v27, %v3122_v23 }
 0x2f5   : > { %v2380_v59 = vpop.eup %2379 }
 0x2f6   : > { %1182 = vmatprep.mubr.f32.mxu1 %v1031_v44  ;;  %v1001_v60 = vmul.f32 %v2380_v59, %v889_v35 }
 0x2f7   : > { %1183 = vmatmul.mubr.f32.gmra.mrb[28].mxu1 %v1030_v62 }
 0x2f8   : > { %v1033_v25 = vmul.f32 %v1001_v60, %v3971_v15  ;;  %v1032_v28 = vmul.f32 %v1001_v60, %v3972_v34 }
 0x2fa   : > { %1188 = vmatprep.mubr.f32.mxu1 %v1033_v25 }
 0x2fb   : > { %1189 = vmatmul.mubr.f32.gmra.mrb[30].mxu1 %v1032_v28 }
 0x392   : > { %v3416_v3 = vpop.f32.mrb[0].mxu1 }
 0x393   : > { %v1195_v8 = vmul.f32 %v3416_v3, %v3416_v3  ;;  %v3420_v29 = vpop.f32.mrb[1].mxu1 }
 0x394   : > { %v1196_v23 = vmul.f32 %v3420_v29, %v3420_v29 }
 0x396   : > { %v3424_v38 = vadd.f32 %v1196_v23, %v1195_v8  ;;  %v3426_v56 = vpop.f32.mrb[2].mxu1 }
 0x397   : > { %v1197_v58 = vmul.f32 %v3426_v56, %v3426_v56  ;;  %v3430_v48 = vpop.f32.mrb[3].mxu1 }
 0x398   : > { %v1198_v16 = vmul.f32 %v3430_v48, %v3430_v48  ;;  %1243 = vrot.lane.b32.xlu0 %v3424_v38, %s2675_s21 }
 0x39a   : > { %v3436_v11 = vadd.f32 %v1198_v16, %v1197_v58  ;;  %v3438_v32 = vpop.f32.mrb[4].mxu1 }
 0x39b   : > { %v1199_v30 = vmul.f32 %v3438_v32, %v3438_v32  ;;  %v3442_v53 = vpop.f32.mrb[5].mxu1 }
 0x39c   : > { %v1200_v6 = vmul.f32 %v3442_v53, %v3442_v53  ;;  %1245 = vrot.lane.b32.xlu0 %v3436_v11, %s2675_s21 }
 0x39e   : > { %v3448_v36 = vadd.f32 %v1200_v6, %v1199_v30  ;;  %v3450_v17 = vpop.f32.mrb[6].mxu1 }
 0x39f   : > { %v1201_v14 = vmul.f32 %v3450_v17, %v3450_v17  ;;  %v3454_v41 = vpop.f32.mrb[7].mxu1 }
 0x3a0   : > { %v1202_v7 = vmul.f32 %v3454_v41, %v3454_v41  ;;  %1247 = vrot.lane.b32.xlu0 %v3448_v36, %s2675_s21 }
 0x3a2   : > { %v3460_v0 = vadd.f32 %v1202_v7, %v1201_v14  ;;  %v3462_v1 = vpop.f32.mrb[8].mxu1 }
 0x3a3   : > { %v1203_v4 = vmul.f32 %v3462_v1, %v3462_v1  ;;  %v3466_v35 = vpop.f32.mrb[9].mxu1 }
 0x3a4   : > { %v1204_v37 = vmul.f32 %v3466_v35, %v3466_v35  ;;  %1249 = vrot.lane.b32.xlu0 %v3460_v0, %s2675_s21 }
 0x3a6   : > { %v3472_v54 = vadd.f32 %v1204_v37, %v1203_v4  ;;  %v3474_v63 = vpop.f32.mrb[10].mxu1 }
 0x3a7   : > { %v1205_v24 = vmul.f32 %v3474_v63, %v3474_v63  ;;  %v3478_v51 = vpop.f32.mrb[11].mxu1 }
 0x3a8   : > { %v1206_v49 = vmul.f32 %v3478_v51, %v3478_v51  ;;  %1251 = vrot.lane.b32.xlu0 %v3472_v54, %s2675_s21 }
 0x3aa   : > { %v3484_v61 = vadd.f32 %v1206_v49, %v1205_v24  ;;  %v3486_v5 = vpop.f32.mrb[12].mxu1 }
 0x3ab   : > { %v1207_v43 = vmul.f32 %v3486_v5, %v3486_v5  ;;  %v3490_v22 = vpop.f32.mrb[13].mxu1 }
 0x3ac   : > { %v1208_v20 = vmul.f32 %v3490_v22, %v3490_v22  ;;  %1253 = vrot.lane.b32.xlu0 %v3484_v61, %s2675_s21 }
 0x3ae   : > { %v3496_v26 = vadd.f32 %v1208_v20, %v1207_v43  ;;  %v3498_v42 = vpop.f32.mrb[14].mxu1 }
 0x3af   : > { %v1209_v40 = vmul.f32 %v3498_v42, %v3498_v42  ;;  %v3502_v39 = vpop.f32.mrb[15].mxu1 }
 0x3b0   : > { %v1210_v31 = vmul.f32 %v3502_v39, %v3502_v39  ;;  %1255 = vrot.lane.b32.xlu0 %v3496_v26, %s2675_s21 }
 0x3b2   : > { %v3508_v46 = vadd.f32 %v1210_v31, %v1209_v40  ;;  %v3510_v21 = vpop.f32.mrb[16].mxu1 }
 0x3b3   : > { %v1211_v13 = vmul.f32 %v3510_v21, %v3510_v21  ;;  %v3514_v45 = vpop.f32.mrb[17].mxu1 }
 0x3b4   : > { %v1212_v47 = vmul.f32 %v3514_v45, %v3514_v45  ;;  %1257 = vrot.lane.b32.xlu0 %v3508_v46, %s2675_s21 }
 0x3b6   : > { %v3520_v33 = vadd.f32 %v1212_v47, %v1211_v13  ;;  %v3522_v18 = vpop.f32.mrb[18].mxu1 }
 0x3b7   : > { %v1213_v2 = vmul.f32 %v3522_v18, %v3522_v18  ;;  %v3526_v19 = vpop.f32.mrb[19].mxu1 }
 0x3b8   : > { %v1214_v50 = vmul.f32 %v3526_v19, %v3526_v19  ;;  %1259 = vrot.lane.b32.xlu1 %v3520_v33, %s2675_s21 }
 0x3ba   : > { %v3532_v52 = vadd.f32 %v1214_v50, %v1213_v2  ;;  %v3534_v12 = vpop.f32.mrb[20].mxu1 }
 0x3bb   : > { %v1215_v9 = vmul.f32 %v3534_v12, %v3534_v12  ;;  %v3538_v57 = vpop.f32.mrb[21].mxu1 }
 0x3bc   : > { %v1216_v55 = vmul.f32 %v3538_v57, %v3538_v57  ;;  %1261 = vrot.lane.b32.xlu1 %v3532_v52, %s2675_s21 }
 0x3be   : > { %v3544_v10 = vadd.f32 %v1216_v55, %v1215_v9  ;;  %v3546_v27 = vpop.f32.mrb[22].mxu1  ;;  %v439_v9 = vld [vmem:[#allocation8 + $0x80] sm:$0xff]  ;;  %v440_v55 = vld [vmem:[#allocation8 + $0x88] sm:$0xff] }
 0x3bf   : > { %v1217_v44 = vmul.f32 %v3546_v27, %v3546_v27  ;;  %v3550_v62 = vpop.f32.mrb[23].mxu1 }
 0x3c0   : > { %v1218_v59 = vmul.f32 %v3550_v62, %v3550_v62  ;;  %1263 = vrot.lane.b32.xlu1 %v3544_v10, %s2675_s21 }
 0x3c2   : > { %v3556_v60 = vadd.f32 %v1218_v59, %v1217_v44  ;;  %v3558_v15 = vpop.f32.mrb[24].mxu1  ;;  %v2152_v59 = vpack.c.bf16 %v440_v55, %v439_v9  ;;  %v444_v9 = vld [vmem:[#allocation8 + $0xa8] sm:$0xff] }
 0x3c3   : > { %v1219_v25 = vmul.f32 %v3558_v15, %v3558_v15  ;;  %v3562_v34 = vpop.f32.mrb[25].mxu1 }
 0x3c4   : > { %v1220_v28 = vmul.f32 %v3562_v34, %v3562_v34  ;;  %1265 = vrot.lane.b32.xlu1 %v3556_v60, %s2675_s21  ;;  %2153 = vmatprep.subr.bf16.mxu0 %v2152_v59 }
 0x3c5   : > { %2184 = vmatprep.subr.bf16.mxu1 %v2152_v59  ;;  %v427_v59 = vld [vmem:[#allocation8 + $0x20] sm:$0xff] }
 0x3c6   : > { %v3568_v8 = vadd.f32 %v1220_v28, %v1219_v25  ;;  %v3570_v23 = vpop.f32.mrb[26].mxu1  ;;  %v423_v25 = vld [vmem:[#allocation8] sm:$0xff]  ;;  %v424_v28 = vld [vmem:[#allocation8 + $0x8] sm:$0xff] }
 0x3c7   : > { %v1221_v58 = vmul.f32 %v3570_v23, %v3570_v23  ;;  %v3574_v16 = vpop.f32.mrb[27].mxu1 }
 0x3c8   : > { %v1222_v30 = vmul.f32 %v3574_v16, %v3574_v16  ;;  %1267 = vrot.lane.b32.xlu1 %v3568_v8, %s2675_s21 }
 0x3ca   : > { %v3580_v6 = vadd.f32 %v1222_v30, %v1221_v58  ;;  %v3582_v14 = vpop.f32.mrb[28].mxu1  ;;  %v442_v30 = vld [vmem:[#allocation8 + $0x98] sm:$0xff] }
 0x3cb   : > { %v1223_v7 = vmul.f32 %v3582_v14, %v3582_v14  ;;  %v3586_v4 = vpop.f32.mrb[29].mxu1 }
 0x3cc   : > { %v1224_v37 = vmul.f32 %v3586_v4, %v3586_v4  ;;  %1269 = vrot.lane.b32.xlu1 %v3580_v6, %s2675_s21 }
 0x3ce   : > { %v3592_v24 = vadd.f32 %v1224_v37, %v1223_v7  ;;  %v3594_v49 = vpop.f32.mrb[30].mxu1 }
 0x3cf   : > { %v1225_v43 = vmul.f32 %v3594_v49, %v3594_v49  ;;  %v3598_v20 = vpop.f32.mrb[31].mxu1 }
 0x3d0   : > { %v1226_v40 = vmul.f32 %v3598_v20, %v3598_v20  ;;  %1271 = vrot.lane.b32.xlu1 %v3592_v24, %s2675_s21 }
 0x3d2   : > { %v3604_v31 = vadd.f32 %v1226_v40, %v1225_v43  ;;  %v425_v43 = vld [vmem:[#allocation8 + $0x10] sm:$0xff]  ;;  %v426_v40 = vld [vmem:[#allocation8 + $0x18] sm:$0xff] }
 0x3d4   : > { %1273 = vrot.lane.b32.xlu1 %v3604_v31, %s2675_s21 }
 0x40a   : > { %v1244_v13 = vpop.permute.xlu0 %1243 }
 0x40b   : > { %v3609_v47 = vadd.f32 %v1244_v13, %v3424_v38  ;;  %v2154_v38 = vpack.c.bf16 %v424_v28, %v423_v25  ;;  %v428_v25 = vld [vmem:[#allocation8 + $0x28] sm:$0xff] }
 0x40d   : > { %1291 = vrot.lane.b32.xlu0 %v3609_v47, %s2676_s23  ;;  %2155 = vmatpush3.bf16.msra.mxu0 %v2154_v38 }
 0x40e   : > { %v1246_v2 = vpop.permute.xlu0 %1245  ;;  %2192 = vmatpush3.bf16.msra.mxu1 %v2154_v38  ;;  %v2162_v38 = vpack.c.bf16 %v428_v25, %v427_v59  ;;  %v432_v59 = vld [vmem:[#allocation8 + $0x48] sm:$0xff] }
 0x40f   : > { %v3614_v50 = vadd.f32 %v1246_v2, %v3436_v11  ;;  %v441_v11 = vld [vmem:[#allocation8 + $0x90] sm:$0xff]  ;;  %v2158_v2 = vpack.c.bf16 %v426_v40, %v425_v43  ;;  %v430_v43 = vld [vmem:[#allocation8 + $0x38] sm:$0xff] }
 0x410   : > { %v2156_v37 = vpack.c.bf16 %v442_v30, %v441_v11  ;;  %v446_v11 = vld [vmem:[#allocation8 + $0xb8] sm:$0xff] }
 0x411   : > { %1293 = vrot.lane.b32.xlu0 %v3614_v50, %s2676_s23 }
 0x412   : > { %v1248_v44 = vpop.permute.xlu0 %1247  ;;  %2157 = vmatprep.subr.bf16.mxu0 %v2156_v37  ;;  %2185 = vmatprep.subr.bf16.mxu1 %v2156_v37  ;;  %v429_v37 = vld [vmem:[#allocation8 + $0x30] sm:$0xff] }
 0x413   : > { %v3619_v58 = vadd.f32 %v1248_v44, %v3448_v36  ;;  %2159 = vmatpush3.bf16.msra.mxu0 %v2158_v2  ;;  %v443_v36 = vld [vmem:[#allocation8 + $0xa0] sm:$0xff]  ;;  %2193 = vmatpush3.bf16.msra.mxu1 %v2158_v2  ;;  %v2166_v2 = vpack.c.bf16 %v430_v43, %v429_v37  ;;  %v434_v37 = vld [vmem:[#allocation8 + $0x58] sm:$0xff] }
 0x414   : > { %v2160_v44 = vpack.c.bf16 %v444_v9, %v443_v36  ;;  %v448_v36 = vld [vmem:[#allocation8 + $0xc8] sm:$0xff] }
 0x415   : > { %1295 = vrot.lane.b32.xlu0 %v3619_v58, %s2676_s23 }
 0x416   : > { %v1250_v7 = vpop.permute.xlu0 %1249  ;;  %2161 = vmatprep.subr.bf16.mxu0 %v2160_v44  ;;  %2186 = vmatprep.subr.bf16.mxu1 %v2160_v44  ;;  %v431_v44 = vld [vmem:[#allocation8 + $0x40] sm:$0xff] }
 0x417   : > { %v3624_v13 = vadd.f32 %v1250_v7, %v3460_v0  ;;  %2163 = vmatpush3.bf16.msra.mxu0 %v2162_v38  ;;  %v445_v0 = vld [vmem:[#allocation8 + $0xb0] sm:$0xff]  ;;  %2194 = vmatpush3.bf16.msra.mxu1 %v2162_v38  ;;  %v2170_v38 = vpack.c.bf16 %v432_v59, %v431_v44  ;;  %v436_v44 = vld [vmem:[#allocation8 + $0x68] sm:$0xff] }
 0x418   : > { %v2164_v7 = vpack.c.bf16 %v446_v11, %v445_v0  ;;  %v450_v0 = vld [vmem:[#allocation8 + $0xd8] sm:$0xff] }
 0x419   : > { %1297 = vrot.lane.b32.xlu0 %v3624_v13, %s2676_s23 }
 0x41a   : > { %v1252_v55 = vpop.permute.xlu0 %1251  ;;  %2165 = vmatprep.subr.bf16.mxu0 %v2164_v7  ;;  %2187 = vmatprep.subr.bf16.mxu1 %v2164_v7  ;;  %v433_v7 = vld [vmem:[#allocation8 + $0x50] sm:$0xff] }
 0x41b   : > { %v3629_v28 = vadd.f32 %v1252_v55, %v3472_v54  ;;  %2167 = vmatpush3.bf16.msra.mxu0 %v2166_v2  ;;  %v447_v54 = vld [vmem:[#allocation8 + $0xc0] sm:$0xff]  ;;  %2195 = vmatpush3.bf16.msra.mxu1 %v2166_v2  ;;  %v2174_v2 = vpack.c.bf16 %v434_v37, %v433_v7  ;;  %v438_v7 = vld [vmem:[#allocation8 + $0x78] sm:$0xff] }
 0x41c   : > { %v2168_v55 = vpack.c.bf16 %v448_v36, %v447_v54  ;;  %v452_v54 = vld [vmem:[#allocation8 + $0xe8] sm:$0xff] }
 0x41d   : > { %1299 = vrot.lane.b32.xlu0 %v3629_v28, %s2676_s23 }
 0x41e   : > { %v1254_v30 = vpop.permute.xlu0 %1253  ;;  %2169 = vmatprep.subr.bf16.mxu0 %v2168_v55  ;;  %2188 = vmatprep.subr.bf16.mxu1 %v2168_v55  ;;  %v435_v55 = vld [vmem:[#allocation8 + $0x60] sm:$0xff] }
 0x41f   : > { %v3634_v40 = vadd.f32 %v1254_v30, %v3484_v61  ;;  %2171 = vmatpush3.bf16.msra.mxu0 %v2170_v38  ;;  %v449_v61 = vld [vmem:[#allocation8 + $0xd0] sm:$0xff]  ;;  %2196 = vmatpush3.bf16.msra.mxu1 %v2170_v38  ;;  %v2178_v38 = vpack.c.bf16 %v436_v44, %v435_v55 }
 0x420   : > { %v2172_v30 = vpack.c.bf16 %v450_v0, %v449_v61  ;;  %v454_v61 = vld [vmem:[#allocation8 + $0xf8] sm:$0xff] }
 0x421   : > { %1301 = vrot.lane.b32.xlu0 %v3634_v40, %s2676_s23 }
 0x422   : > { %v1256_v9 = vpop.permute.xlu0 %1255  ;;  %2173 = vmatprep.subr.bf16.mxu0 %v2172_v30  ;;  %2189 = vmatprep.subr.bf16.mxu1 %v2172_v30  ;;  %v437_v30 = vld [vmem:[#allocation8 + $0x70] sm:$0xff] }
 0x423   : > { %v3639_v25 = vadd.f32 %v1256_v9, %v3496_v26  ;;  %2175 = vmatpush3.bf16.msra.mxu0 %v2174_v2  ;;  %v451_v26 = vld [vmem:[#allocation8 + $0xe0] sm:$0xff]  ;;  %2197 = vmatpush3.bf16.msra.mxu1 %v2174_v2  ;;  %v2182_v2 = vpack.c.bf16 %v438_v7, %v437_v30 }
 0x424   : > { %v2176_v9 = vpack.c.bf16 %v452_v54, %v451_v26 }
 0x425   : > { %1303 = vrot.lane.b32.xlu0 %v3639_v25, %s2676_s23 }
 0x426   : > { %v1258_v11 = vpop.permute.xlu0 %1257  ;;  %2177 = vmatprep.subr.bf16.mxu0 %v2176_v9  ;;  %2190 = vmatprep.subr.bf16.mxu1 %v2176_v9 }
 0x427   : > { %v3644_v43 = vadd.f32 %v1258_v11, %v3508_v46  ;;  %2179 = vmatpush3.bf16.msra.mxu0 %v2178_v38  ;;  %v453_v46 = vld [vmem:[#allocation8 + $0xf0] sm:$0xff]  ;;  %2198 = vmatpush3.bf16.msra.mxu1 %v2178_v38 }
 0x428   : > { %v2180_v11 = vpack.c.bf16 %v454_v61, %v453_v46 }
 0x429   : > { %1305 = vrot.lane.b32.xlu0 %v3644_v43, %s2676_s23 }
 0x42a   : > { %v1260_v36 = vpop.permute.xlu1 %1259  ;;  %2181 = vmatprep.subr.bf16.mxu0 %v2180_v11  ;;  %2191 = vmatprep.subr.bf16.mxu1 %v2180_v11 }
 0x42b   : > { %v3649_v59 = vadd.f32 %v1260_v36, %v3520_v33  ;;  %2183 = vmatpush3.bf16.msra.mxu0 %v2182_v2  ;;  %2199 = vmatpush3.bf16.msra.mxu1 %v2182_v2 }
 0x42d   : > { %1307 = vrot.lane.b32.xlu1 %v3649_v59, %s2676_s23 }
 0x42e   : > { %v1262_v0 = vpop.permute.xlu1 %1261 }
 0x42f   : > { %v3654_v37 = vadd.f32 %v1262_v0, %v3532_v52 }
 0x431   : > { %1309 = vrot.lane.b32.xlu1 %v3654_v37, %s2676_s23 }
 0x432   : > { %v1264_v33 = vpop.permute.xlu1 %1263 }
 0x433   : > { %v3659_v26 = vadd.f32 %v1264_v33, %v3544_v10 }
 0x435   : > { %1311 = vrot.lane.b32.xlu1 %v3659_v26, %s2676_s23 }
 0x436   : > { %v1266_v54 = vpop.permute.xlu1 %1265 }
 0x437   : > { %v3664_v36 = vadd.f32 %v1266_v54, %v3556_v60 }
 0x439   : > { %1313 = vrot.lane.b32.xlu1 %v3664_v36, %s2676_s23 }
 0x43a   : > { %v1268_v52 = vpop.permute.xlu1 %1267 }
 0x43b   : > { %v3669_v9 = vadd.f32 %v1268_v52, %v3568_v8 }
 0x43d   : > { %1315 = vrot.lane.b32.xlu1 %v3669_v9, %s2676_s23 }
 0x43e   : > { %v1270_v55 = vpop.permute.xlu1 %1269 }
 0x43f   : > { %v3674_v10 = vadd.f32 %v1270_v55, %v3580_v6 }
 0x441   : > { %1317 = vrot.lane.b32.xlu1 %v3674_v10, %s2676_s23 }
 0x442   : > { %v1272_v44 = vpop.permute.xlu1 %1271 }
 0x443   : > { %v3679_v60 = vadd.f32 %v1272_v44, %v3592_v24 }
 0x445   : > { %1319 = vrot.lane.b32.xlu1 %v3679_v60, %s2676_s23 }
 0x446   : > { %v1274_v38 = vpop.permute.xlu1 %1273 }
 0x447   : > { %v3684_v8 = vadd.f32 %v1274_v38, %v3604_v31 }
 0x449   : > { %1321 = vrot.lane.b32.xlu1 %v3684_v8, %s2676_s23 }
 0x47f   : > { %v1292_v46 = vpop.permute.xlu0 %1291 }
 0x480   : > { %v1323_v6 = vadd.f32 %v1292_v46, %v3609_v47 }
 0x482   : > { %v1339_v61 = vadd.f32 1e-06, %v1323_v6 }
 0x483   : > { %v1294_v0 = vpop.permute.xlu0 %1293 }
 0x484   : > { %2381 = vrsqrt.f32 %v1339_v61  ;;  %v1324_v11 = vadd.f32 %v1294_v0, %v3614_v50  ;;  %vm1357_vm0 = vcmp.eq.f32.partialorder %v1339_v61, inf  ;;  %v1360_v38 = vand.u32 2147483648, %v1339_v61 }
 0x485   : > { %vm1359_vm1 = vcmp.eq.f32.partialorder %v1339_v61, 0.0 }
 0x486   : > { %v1340_v24 = vadd.f32 1e-06, %v1324_v11 }
 0x487   : > { %v1296_v30 = vpop.permute.xlu0 %1295 }
 0x488   : > { %2383 = vrsqrt.f32 %v1340_v24  ;;  %v1325_v7 = vadd.f32 %v1296_v30, %v3619_v58  ;;  %vm1364_vm2 = vcmp.eq.f32.partialorder %v1340_v24, inf  ;;  %vm1366_vm3 = vcmp.eq.f32.partialorder %v1340_v24, 0.0 }
 0x48a   : > { %v1341_v2 = vadd.f32 1e-06, %v1325_v7  ;;  %v1367_v7 = vand.u32 2147483648, %v1340_v24 }
 0x48b   : > { %v1298_v33 = vpop.permute.xlu0 %1297 }
 0x48c   : > { %2385 = vrsqrt.f32 %v1341_v2  ;;  %v1326_v31 = vadd.f32 %v1298_v33, %v3624_v13  ;;  %vm1371_vm4 = vcmp.eq.f32.partialorder %v1341_v2, inf  ;;  %vm1373_vm5 = vcmp.eq.f32.partialorder %v1341_v2, 0.0 }
 0x48e   : > { %v2382_v54 = vpop.eup %2381  ;;  %v1342_v52 = vadd.f32 1e-06, %v1326_v31 }
 0x48f   : > { %v1300_v55 = vpop.permute.xlu0 %1299  ;;  %v1356_v44 = vmul.f32 %v2382_v54, %v1339_v61 }
 0x490   : > { %2387 = vrsqrt.f32 %v1342_v52  ;;  %v1327_v47 = vadd.f32 %v1300_v55, %v3629_v28  ;;  %vm1378_vm6 = vcmp.eq.f32.partialorder %v1342_v52, inf  ;;  %vm1380_vm7 = vcmp.eq.f32.partialorder %v1342_v52, 0.0 }
 0x491   : > { %v1358_v50 = vsel %vm1357_vm0, %v1339_v61, %v1356_v44 }
 0x492   : > { %v2384_v46 = vpop.eup %2383  ;;  %v1343_v6 = vadd.f32 1e-06, %v1327_v47  ;;  %v3693_v0 = vsel %vm1359_vm1, %v1360_v38, %v1358_v50  ;;  %v1374_v38 = vand.u32 2147483648, %v1341_v2 }
 0x493   : > { %v1302_v58 = vpop.permute.xlu0 %1301  ;;  %v1920_v11 = vmul.f32 -1.442695, %v3693_v0  ;;  %v1363_v30 = vmul.f32 %v2384_v46, %v1340_v24 }
 0x494   : > { %2389 = vrsqrt.f32 %v1343_v6  ;;  %v1328_v13 = vadd.f32 %v1302_v58, %v3634_v40  ;;  %vm1385_vm8 = vcmp.eq.f32.partialorder %v1343_v6, inf  ;;  %vm1387_vm9 = vcmp.eq.f32.partialorder %v1343_v6, 0.0 }
 0x495   : > { %2391 = vpow2.f32 %v1920_v11  ;;  %v1365_v33 = vsel %vm1364_vm2, %v1340_v24, %v1363_v30 }
 0x496   : > { %v2386_v28 = vpop.eup %2385  ;;  %v1344_v31 = vadd.f32 1e-06, %v1328_v13  ;;  %v3697_v54 = vsel %vm1366_vm3, %v1367_v7, %v1365_v33 }
 0x497   : > { %v1304_v61 = vpop.permute.xlu0 %1303  ;;  %v1921_v55 = vmul.f32 -1.442695, %v3697_v54  ;;  %v1370_v44 = vmul.f32 %v2386_v28, %v1341_v2 }
 0x498   : > { %2393 = vrsqrt.f32 %v1344_v31  ;;  %v1329_v47 = vadd.f32 %v1304_v61, %v3639_v25  ;;  %v1381_v25 = vand.u32 2147483648, %v1342_v52  ;;  %vm1392_vm10 = vcmp.eq.f32.partialorder %v1344_v31, inf }
 0x499   : > { %2395 = vpow2.f32 %v1921_v55  ;;  %v1372_v40 = vsel %vm1371_vm4, %v1341_v2, %v1370_v44  ;;  %vm1394_vm11 = vcmp.eq.f32.partialorder %v1344_v31, 0.0 }
 0x49a   : > { %v2388_v50 = vpop.eup %2387  ;;  %v3701_v46 = vadd.f32 1e-06, %v1329_v47  ;;  %v3703_v24 = vsel %vm1373_vm5, %v1374_v38, %v1372_v40  ;;  %v1388_v40 = vand.u32 2147483648, %v1343_v6 }
 0x49b   : > { %v1306_v58 = vpop.permute.xlu0 %1305  ;;  %v1922_v11 = vmul.f32 -1.442695, %v3703_v24  ;;  %v1377_v30 = vmul.f32 %v2388_v50, %v1342_v52 }
 0x49c   : > { %2397 = vrsqrt.f32 %v3701_v46  ;;  %v1330_v13 = vadd.f32 %v1306_v58, %v3644_v43  ;;  %vm1399_vm12 = vcmp.eq.f32.partialorder %v3701_v46, inf  ;;  %vm1401_vm13 = vcmp.eq.f32.partialorder %v3701_v46, 0.0 }
 0x49d   : > { %2399 = vpow2.f32 %v1922_v11  ;;  %v1379_v7 = vsel %vm1378_vm6, %v1342_v52, %v1377_v30 }
 0x49e   : > { %v2390_v33 = vpop.eup %2389  ;;  %v3708_v2 = vadd.f32 1e-06, %v1330_v13  ;;  %v3710_v28 = vsel %vm1380_vm7, %v1381_v25, %v1379_v7 }
 0x49f   : > { %v2392_v61 = vpop.eup %2391  ;;  %v1308_v55 = vpop.permute.xlu1 %1307  ;;  %v1923_v44 = vmul.f32 -1.442695, %v3710_v28  ;;  %v1384_v47 = vmul.f32 %v2390_v33, %v1343_v6 }
 0x4a0   : > { %2401 = vrsqrt.f32 %v3708_v2  ;;  %v1331_v43 = vadd.f32 %v1308_v55, %v3649_v59  ;;  %v1515_v38 = vadd.f32 1.0, %v2392_v61  ;;  %v1395_v61 = vand.u32 2147483648, %v1344_v31 }
 0x4a1   : > { %2403 = vpow2.f32 %v1923_v44  ;;  %v1386_v50 = vsel %vm1385_vm8, %v1343_v6, %v1384_v47  ;;  %vm1406_vm14 = vcmp.eq.f32.partialorder %v3708_v2, inf  ;;  %vm1408_vm15 = vcmp.eq.f32.partialorder %v3708_v2, 0.0 }
 0x4a2   : > { %v2394_v52 = vpop.eup %2393  ;;  %v3715_v58 = vadd.f32 1e-06, %v1331_v43  ;;  %2405 = vrcp.f32 %v1515_v38  ;;  %v3717_v11 = vsel %vm1387_vm9, %v1388_v40, %v1386_v50 }
 0x4a3   : > { %v2396_v30 = vpop.eup %2395  ;;  %v1310_v13 = vpop.permute.xlu1 %1309  ;;  %v1924_v25 = vmul.f32 -1.442695, %v3717_v11  ;;  %v1391_v7 = vmul.f32 %v2394_v52, %v1344_v31 }
 0x4a4   : > { %2407 = vrsqrt.f32 %v3715_v58  ;;  %v1332_v59 = vadd.f32 %v1310_v13, %v3654_v37  ;;  %v1516_v33 = vadd.f32 1.0, %v2396_v30  ;;  %vm1413_vm0 = vcmp.eq.f32.partialorder %v3715_v58, inf }
 0x4a5   : > { %2409 = vpow2.f32 %v1924_v25  ;;  %v1393_v6 = vsel %vm1392_vm10, %v1344_v31, %v1391_v7  ;;  %v1402_v31 = vand.u32 2147483648, %v3701_v46  ;;  %vm1415_vm1 = vcmp.eq.f32.partialorder %v3715_v58, 0.0 }
 0x4a6   : > { %v2398_v55 = vpop.eup %2397  ;;  %v3722_v44 = vadd.f32 1e-06, %v1332_v59  ;;  %2411 = vrcp.f32 %v1516_v33  ;;  %v3724_v47 = vsel %vm1394_vm11, %v1395_v61, %v1393_v6 }
 0x4a7   : > { %v2400_v43 = vpop.eup %2399  ;;  %v1312_v38 = vpop.permute.xlu1 %1311  ;;  %v1925_v40 = vmul.f32 -1.442695, %v3724_v47  ;;  %v1398_v50 = vmul.f32 %v2398_v55, %v3701_v46 }
 0x4a8   : > { %2413 = vrsqrt.f32 %v3722_v44  ;;  %v1333_v37 = vadd.f32 %v1312_v38, %v3659_v26  ;;  %v1517_v52 = vadd.f32 1.0, %v2400_v43  ;;  %v1409_v43 = vand.u32 2147483648, %v3708_v2 }
 0x4a9   : > { %2415 = vpow2.f32 %v1925_v40  ;;  %v1400_v30 = vsel %vm1399_vm12, %v3701_v46, %v1398_v50  ;;  %vm1420_vm2 = vcmp.eq.f32.partialorder %v3722_v44, inf  ;;  %vm1422_vm3 = vcmp.eq.f32.partialorder %v3722_v44, 0.0 }
 0x4aa   : > { %v2402_v13 = vpop.eup %2401  ;;  %v3734_v25 = vadd.f32 1e-06, %v1333_v37  ;;  %2417 = vrcp.f32 %v1517_v52  ;;  %v3736_v7 = vsel %vm1401_vm13, %v1402_v31, %v1400_v30 }
 0x4ab   : > { %v2404_v59 = vpop.eup %2403  ;;  %v1314_v33 = vpop.permute.xlu1 %1313  ;;  %v1926_v61 = vmul.f32 -1.442695, %v3736_v7  ;;  %v1405_v26 = vmul.f32 %v2402_v13, %v3708_v2 }
 0x4ac   : > { %v2406_v6 = vpop.eup %2405  ;;  %2419 = vrsqrt.f32 %v3734_v25  ;;  %v1334_v55 = vadd.f32 %v1314_v33, %v3664_v36  ;;  %v1518_v46 = vadd.f32 1.0, %v2404_v59  ;;  %vm1427_vm4 = vcmp.eq.f32.partialorder %v3734_v25, inf }
 0x4ad   : > { %v1563_v38 = vmul.f32 %v2406_v6, %v3693_v0  ;;  %2421 = vpow2.f32 %v1926_v61  ;;  %v1407_v40 = vsel %vm1406_vm14, %v3708_v2, %v1405_v26  ;;  %v1416_v26 = vand.u32 2147483648, %v3715_v58 }
 0x4ae   : > { %v2408_v50 = vpop.eup %2407  ;;  %v3747_v37 = vadd.f32 1e-06, %v1334_v55  ;;  %2423 = vrcp.f32 %v1518_v46  ;;  %v3749_v52 = vsel %vm1408_vm15, %v1409_v43, %v1407_v40  ;;  %vm1429_vm5 = vcmp.eq.f32.partialorder %v3734_v25, 0.0 }
 0x4af   : > { %v2410_v31 = vpop.eup %2409  ;;  %v1316_v36 = vpop.permute.xlu1 %1315  ;;  %v1579_v30 = vmul.f32 %v1563_v38, %v3416_v3  ;;  %v1580_v13 = vmul.f32 %v1563_v38, %v3420_v29  ;;  %v1927_v0 = vmul.f32 -1.442695, %v3749_v52  ;;  %v1412_v59 = vmul.f32 %v2408_v50, %v3715_v58 }
 0x4b0   : > { %v2412_v33 = vpop.eup %2411  ;;  %2425 = vrsqrt.f32 %v3747_v37  ;;  %v1335_v2 = vadd.f32 %v1316_v36, %v3669_v9  ;;  %v1519_v61 = vadd.f32 1.0, %v2410_v31  ;;  %vm1434_vm6 = vcmp.eq.f32.partialorder %v3747_v37, inf }
 0x4b1   : > { %1675 = vmatprep.mubr.f32.mxu0 %v1580_v13  ;;  %v1564_v6 = vmul.f32 %v2412_v33, %v3697_v54  ;;  %2427 = vpow2.f32 %v1927_v0  ;;  %v1414_v3 = vsel %vm1413_vm0, %v3715_v58, %v1412_v59  ;;  %vm1436_vm7 = vcmp.eq.f32.partialorder %v3747_v37, 0.0 }
 0x4b2   : > { %v2414_v29 = vpop.eup %2413  ;;  %v3762_v55 = vadd.f32 1e-06, %v1335_v2  ;;  %1676 = vmatmul.mubr.f32.vlgmr.msra.gmra.mrb[32].mxu0 %v1579_v30  ;;  %2429 = vrcp.f32 %v1519_v61  ;;  %v3764_v46 = vsel %vm1415_vm1, %v1416_v26, %v1414_v3  ;;  %v1423_v30 = vand.u32 2147483648, %v3722_v44 }
 0x4b3   : > { %v2416_v9 = vpop.eup %2415  ;;  %v1318_v43 = vpop.permute.xlu1 %1317  ;;  %v1582_v38 = vmul.f32 %v1564_v6, %v3430_v48  ;;  %v1581_v54 = vmul.f32 %v1564_v6, %v3426_v56  ;;  %v1928_v40 = vmul.f32 -1.442695, %v3764_v46  ;;  %v1419_v50 = vmul.f32 %v2414_v29, %v3722_v44 }
 0x4b4   : > { %v2418_v58 = vpop.eup %2417  ;;  %2431 = vrsqrt.f32 %v3762_v55  ;;  %v1336_v31 = vadd.f32 %v1318_v43, %v3674_v10  ;;  %v1520_v36 = vadd.f32 1.0, %v2416_v9  ;;  %v1430_v29 = vand.u32 2147483648, %v3734_v25 }
 0x4b5   : > { %1680 = vmatprep.mubr.f32.mxu0 %v1582_v38  ;;  %v1565_v13 = vmul.f32 %v2418_v58, %v3703_v24  ;;  %2433 = vpow2.f32 %v1928_v40  ;;  %v1421_v48 = vsel %vm1420_vm2, %v3722_v44, %v1419_v50  ;;  %vm1441_vm8 = vcmp.eq.f32.partialorder %v3762_v55, inf }
 0x4b6   : > { %v2420_v56 = vpop.eup %2419  ;;  %v3777_v0 = vadd.f32 1e-06, %v1336_v31  ;;  %1681 = vmatmul.mubr.f32.gmra.mrb[34].mxu0 %v1581_v54  ;;  %2435 = vrcp.f32 %v1520_v36  ;;  %v3779_v59 = vsel %vm1422_vm3, %v1423_v30, %v1421_v48  ;;  %v1437_v30 = vand.u32 2147483648, %v3747_v37 }
 0x4b7   : > { %v2422_v10 = vpop.eup %2421  ;;  %v1320_v33 = vpop.permute.xlu1 %1319  ;;  %v1584_v2 = vmul.f32 %v1565_v13, %v3442_v53  ;;  %v1583_v24 = vmul.f32 %v1565_v13, %v3438_v32  ;;  %v1929_v61 = vmul.f32 -1.442695, %v3779_v59  ;;  %v1426_v26 = vmul.f32 %v2420_v56, %v3734_v25 }
 0x4b8   : > { %v2424_v44 = vpop.eup %2423  ;;  %2437 = vrsqrt.f32 %v3777_v0  ;;  %v1337_v6 = vadd.f32 %v1320_v33, %v3679_v60  ;;  %v1521_v3 = vadd.f32 1.0, %v2422_v10  ;;  %vm1443_vm9 = vcmp.eq.f32.partialorder %v3762_v55, 0.0 }
 0x4b9   : > { %1685 = vmatprep.mubr.f32.mxu0 %v1584_v2  ;;  %v1566_v9 = vmul.f32 %v2424_v44, %v3710_v28  ;;  %2439 = vpow2.f32 %v1929_v61  ;;  %v1428_v53 = vsel %vm1427_vm4, %v3734_v25, %v1426_v26  ;;  %v1444_v61 = vand.u32 2147483648, %v3762_v55 }
 0x4ba   : > { %v2426_v32 = vpop.eup %2425  ;;  %v3792_v43 = vadd.f32 1e-06, %v1337_v6  ;;  %1686 = vmatmul.mubr.f32.gmra.mrb[36].mxu0 %v1583_v24  ;;  %2441 = vrcp.f32 %v1521_v3  ;;  %v3794_v38 = vsel %vm1429_vm5, %v1430_v29, %v1428_v53  ;;  %vm1448_vm10 = vcmp.eq.f32.partialorder %v3777_v0, inf }
 0x4bb   : > { %v2428_v60 = vpop.eup %2427  ;;  %v1322_v54 = vpop.permute.xlu1 %1321  ;;  %v1586_v40 = vmul.f32 %v1566_v9, %v3454_v41  ;;  %v1585_v28 = vmul.f32 %v1566_v9, %v3450_v17  ;;  %v1930_v50 = vmul.f32 -1.442695, %v3794_v38  ;;  %v1433_v58 = vmul.f32 %v2426_v32, %v3747_v37 }
 0x4bc   : > { %v2430_v25 = vpop.eup %2429  ;;  %2443 = vrsqrt.f32 %v3792_v43  ;;  %v1338_v31 = vadd.f32 %v1322_v54, %v3684_v8  ;;  %v1522_v36 = vadd.f32 1.0, %v2428_v60  ;;  %vm1450_vm11 = vcmp.eq.f32.partialorder %v3777_v0, 0.0 }
 0x4bd   : > { %1690 = vmatprep.mubr.f32.mxu0 %v1586_v40  ;;  %v1567_v13 = vmul.f32 %v2430_v25, %v3717_v11  ;;  %2445 = vpow2.f32 %v1930_v50  ;;  %v1435_v41 = vsel %vm1434_vm6, %v3747_v37, %v1433_v58  ;;  %vm1455_vm12 = vcmp.eq.f32.partialorder %v3792_v43, inf }
 0x4be   : > { %v2432_v17 = vpop.eup %2431  ;;  %v3807_v48 = vadd.f32 1e-06, %v1338_v31  ;;  %1691 = vmatmul.mubr.f32.gmra.mrb[38].mxu0 %v1585_v28  ;;  %2447 = vrcp.f32 %v1522_v36  ;;  %v3809_v56 = vsel %vm1436_vm7, %v1437_v30, %v1435_v41  ;;  %vm1457_vm13 = vcmp.eq.f32.partialorder %v3792_v43, 0.0 }
 0x4bf   : > { %v2434_v10 = vpop.eup %2433  ;;  %v1588_v8 = vmul.f32 %v1567_v13, %v3466_v35  ;;  %v1587_v33 = vmul.f32 %v1567_v13, %v3462_v1  ;;  %v1931_v2 = vmul.f32 -1.442695, %v3809_v56  ;;  %v1440_v11 = vmul.f32 %v2432_v17, %v3762_v55 }
 0x4c0   : > { %v2436_v24 = vpop.eup %2435  ;;  %2449 = vrsqrt.f32 %v3807_v48  ;;  %v1523_v37 = vadd.f32 1.0, %v2434_v10  ;;  %vm1462_vm14 = vcmp.eq.f32.partialorder %v3807_v48, inf  ;;  %vm1464_vm15 = vcmp.eq.f32.partialorder %v3807_v48, 0.0 }
 0x4c1   : > { %1695 = vmatprep.mubr.f32.mxu0 %v1588_v8  ;;  %v1568_v26 = vmul.f32 %v2436_v24, %v3724_v47  ;;  %2451 = vpow2.f32 %v1931_v2  ;;  %v1442_v35 = vsel %vm1441_vm8, %v3762_v55, %v1440_v11  ;;  %v1451_v55 = vand.u32 2147483648, %v3777_v0 }
 0x4c2   : > { %v2438_v1 = vpop.eup %2437  ;;  %1696 = vmatmul.mubr.f32.gmra.mrb[40].mxu0 %v1587_v33  ;;  %2453 = vrcp.f32 %v1523_v37  ;;  %v3821_v44 = vsel %vm1443_vm9, %v1444_v61, %v1442_v35 }
 0x4c3   : > { %v2440_v6 = vpop.eup %2439  ;;  %v1590_v3 = vmul.f32 %v1568_v26, %v3478_v51  ;;  %v1589_v29 = vmul.f32 %v1568_v26, %v3474_v63  ;;  %v1932_v9 = vmul.f32 -1.442695, %v3821_v44  ;;  %v1447_v53 = vmul.f32 %v2438_v1, %v3777_v0 }
 0x4c4   : > { %v2442_v47 = vpop.eup %2441  ;;  %v1524_v32 = vadd.f32 1.0, %v2440_v6 }
 0x4c5   : > { %1700 = vmatprep.mubr.f32.mxu0 %v1590_v3  ;;  %v1569_v60 = vmul.f32 %v2442_v47, %v3736_v7  ;;  %2455 = vpow2.f32 %v1932_v9  ;;  %v1449_v54 = vsel %vm1448_vm10, %v3777_v0, %v1447_v53  ;;  %v1458_v0 = vand.u32 2147483648, %v3792_v43 }
 0x4c6   : > { %v2444_v51 = vpop.eup %2443  ;;  %1701 = vmatmul.mubr.f32.gmra.mrb[42].mxu0 %v1589_v29  ;;  %2457 = vrcp.f32 %v1524_v32  ;;  %v3832_v63 = vsel %vm1450_vm11, %v1451_v55, %v1449_v54 }
 0x4c7   : > { %v2446_v40 = vpop.eup %2445  ;;  %v1592_v28 = vmul.f32 %v1569_v60, %v3490_v22  ;;  %v1591_v50 = vmul.f32 %v1569_v60, %v3486_v5  ;;  %v1933_v58 = vmul.f32 -1.442695, %v3832_v63  ;;  %v1454_v25 = vmul.f32 %v2444_v51, %v3792_v43 }
 0x4c8   : > { %v2448_v7 = vpop.eup %2447  ;;  %v1525_v31 = vadd.f32 1.0, %v2446_v40 }
 0x4c9   : > { %1705 = vmatprep.mubr.f32.mxu0 %v1592_v28  ;;  %v1570_v36 = vmul.f32 %v2448_v7, %v3749_v52  ;;  %2459 = vpow2.f32 %v1933_v58  ;;  %v1456_v30 = vsel %vm1455_vm12, %v3792_v43, %v1454_v25  ;;  %v1465_v43 = vand.u32 2147483648, %v3807_v48 }
 0x4ca   : > { %v2450_v22 = vpop.eup %2449  ;;  %1706 = vmatmul.mubr.f32.gmra.mrb[44].mxu0 %v1591_v50  ;;  %2461 = vrcp.f32 %v1525_v31  ;;  %v3843_v5 = vsel %vm1457_vm13, %v1458_v0, %v1456_v30 }
 0x4cb   : > { %v2452_v13 = vpop.eup %2451  ;;  %v1594_v41 = vmul.f32 %v1570_v36, %v3502_v39  ;;  %v1593_v17 = vmul.f32 %v1570_v36, %v3498_v42  ;;  %v1934_v10 = vmul.f32 -1.442695, %v3843_v5  ;;  %v1461_v8 = vmul.f32 %v2450_v22, %v3807_v48 }
 0x4cc   : > { %v2454_v52 = vpop.eup %2453  ;;  %v1526_v33 = vadd.f32 1.0, %v2452_v13 }
 0x4cd   : > { %1710 = vmatprep.mubr.f32.mxu0 %v1594_v41  ;;  %v1571_v2 = vmul.f32 %v2454_v52, %v3764_v46  ;;  %2463 = vpow2.f32 %v1934_v10  ;;  %v1463_v11 = vsel %vm1462_vm14, %v3807_v48, %v1461_v8 }
 0x4ce   : > { %1711 = vmatmul.mubr.f32.gmra.mrb[46].mxu0 %v1593_v17  ;;  %2465 = vrcp.f32 %v1526_v33  ;;  %v1466_v42 = vsel %vm1464_vm15, %v1465_v43, %v1463_v11 }
 0x4cf   : > { %v2456_v39 = vpop.eup %2455  ;;  %v1595_v24 = vmul.f32 %v1571_v2, %v3510_v21  ;;  %v1596_v37 = vmul.f32 %v1571_v2, %v3514_v45  ;;  %v1935_v61 = vmul.f32 -1.442695, %v1466_v42 }
 0x4d0   : > { %v2458_v26 = vpop.eup %2457  ;;  %v1527_v35 = vadd.f32 1.0, %v2456_v39 }
 0x4d1   : > { %1715 = vmatprep.mubr.f32.mxu1 %v1596_v37  ;;  %v1572_v1 = vmul.f32 %v2458_v26, %v3779_v59  ;;  %2467 = vpow2.f32 %v1935_v61 }
 0x4d2   : > { %1716 = vmatmul.mubr.f32.vlgmr.msra.gmra.mrb[32].mxu1 %v1595_v24  ;;  %2469 = vrcp.f32 %v1527_v35 }
 0x4d3   : > { %v2460_v46 = vpop.eup %2459  ;;  %v1598_v48 = vmul.f32 %v1572_v1, %v3526_v19  ;;  %v1597_v6 = vmul.f32 %v1572_v1, %v3522_v18 }
 0x4d4   : > { %v2462_v3 = vpop.eup %2461  ;;  %v1528_v29 = vadd.f32 1.0, %v2460_v46 }
 0x4d5   : > { %1720 = vmatprep.mubr.f32.mxu1 %v1598_v48  ;;  %v1573_v21 = vmul.f32 %v2462_v3, %v3794_v38 }
 0x4d6   : > { %1721 = vmatmul.mubr.f32.gmra.mrb[34].mxu1 %v1597_v6  ;;  %2471 = vrcp.f32 %v1528_v29 }
 0x4d7   : > { %v2464_v45 = vpop.eup %2463  ;;  %v1600_v9 = vmul.f32 %v1573_v21, %v3538_v57  ;;  %v1599_v59 = vmul.f32 %v1573_v21, %v3534_v12 }
 0x4d8   : > { %v2466_v53 = vpop.eup %2465  ;;  %v1529_v47 = vadd.f32 1.0, %v2464_v45 }
 0x4d9   : > { %1725 = vmatprep.mubr.f32.mxu1 %v1600_v9  ;;  %v1574_v32 = vmul.f32 %v2466_v53, %v3809_v56 }
 0x4da   : > { %1726 = vmatmul.mubr.f32.gmra.mrb[36].mxu1 %v1599_v59  ;;  %2473 = vrcp.f32 %v1529_v47 }
 0x4db   : > { %v2468_v18 = vpop.eup %2467  ;;  %v1602_v19 = vmul.f32 %v1574_v32, %v3550_v62  ;;  %v1601_v55 = vmul.f32 %v1574_v32, %v3546_v27 }
 0x4dc   : > { %v2470_v38 = vpop.eup %2469  ;;  %v1530_v60 = vadd.f32 1.0, %v2468_v18 }
 0x4dd   : > { %1730 = vmatprep.mubr.f32.mxu1 %v1602_v19  ;;  %v1575_v54 = vmul.f32 %v2470_v38, %v3821_v44 }
 0x4de   : > { %1731 = vmatmul.mubr.f32.gmra.mrb[38].mxu1 %v1601_v55  ;;  %2475 = vrcp.f32 %v1530_v60 }
 0x4df   : > { %v1604_v12 = vmul.f32 %v1575_v54, %v3562_v34  ;;  %v1603_v57 = vmul.f32 %v1575_v54, %v3558_v15 }
 0x4e0   : > { %v2472_v51 = vpop.eup %2471 }
 0x4e1   : > { %1735 = vmatprep.mubr.f32.mxu1 %v1604_v12  ;;  %v1576_v56 = vmul.f32 %v2472_v51, %v3832_v63 }
 0x4e2   : > { %1736 = vmatmul.mubr.f32.gmra.mrb[40].mxu1 %v1603_v57 }
 0x4e3   : > { %v1606_v62 = vmul.f32 %v1576_v56, %v3574_v16  ;;  %v1605_v27 = vmul.f32 %v1576_v56, %v3570_v23 }
 0x4e4   : > { %v2474_v40 = vpop.eup %2473 }
 0x4e5   : > { %1740 = vmatprep.mubr.f32.mxu1 %v1606_v62  ;;  %v1577_v44 = vmul.f32 %v2474_v40, %v3843_v5 }
 0x4e6   : > { %1741 = vmatmul.mubr.f32.gmra.mrb[42].mxu1 %v1605_v27 }
 0x4e7   : > { %v1608_v28 = vmul.f32 %v1577_v44, %v3586_v4  ;;  %v1607_v34 = vmul.f32 %v1577_v44, %v3582_v14 }
 0x4e8   : > { %v2476_v15 = vpop.eup %2475 }
 0x4e9   : > { %1745 = vmatprep.mubr.f32.mxu1 %v1608_v28  ;;  %v1578_v50 = vmul.f32 %v2476_v15, %v1466_v42 }
 0x4ea   : > { %1746 = vmatmul.mubr.f32.gmra.mrb[44].mxu1 %v1607_v34 }
 0x4eb   : > { %v1610_v63 = vmul.f32 %v1578_v50, %v3598_v20  ;;  %v1609_v16 = vmul.f32 %v1578_v50, %v3594_v49 }
 0x4ed   : > { %1750 = vmatprep.mubr.f32.mxu1 %v1610_v63 }
 0x4ee   : > { %1751 = vmatmul.mubr.f32.gmra.mrb[46].mxu1 %v1609_v16 }
 0x585   : > { %v1976_v23 = vpop.f32.mrb[32].mxu0 }
 0x586   : > { %v1977_v58 = vpop.f32.mrb[33].mxu0 }
 0x587   : > { %v1978_v25 = vadd.f32 %v1977_v58, %v1976_v23 }
 0x589   : > { %1756 = vst [vmem:[%s3877_s20] sm:$0xff] %v1978_v25  ;;  %v1979_v14 = vpop.f32.mrb[34].mxu0 }
 0x58a   : > { %v1980_v4 = vpop.f32.mrb[35].mxu0 }
 0x58b   : > { %v1981_v7 = vadd.f32 %v1980_v4, %v1979_v14 }
 0x58d   : > { %1757 = vst [vmem:[%s3877_s20 + $0x8] sm:$0xff] %v1981_v7  ;;  %v1982_v49 = vpop.f32.mrb[36].mxu0 }
 0x58e   : > { %v1983_v20 = vpop.f32.mrb[37].mxu0 }
 0x58f   : > { %v1984_v31 = vadd.f32 %v1983_v20, %v1982_v49 }
 0x591   : > { %1758 = vst [vmem:[%s3877_s20 + $0x10] sm:$0xff] %v1984_v31  ;;  %v1985_v0 = vpop.f32.mrb[38].mxu0 }
 0x592   : > { %v1986_v36 = vpop.f32.mrb[39].mxu0 }
 0x593   : > { %v1987_v30 = vadd.f32 %v1986_v36, %v1985_v0 }
 0x595   : > { %1759 = vst [vmem:[%s3877_s20 + $0x18] sm:$0xff] %v1987_v30  ;;  %v1988_v22 = vpop.f32.mrb[40].mxu0 }
 0x596   : > { %v1989_v5 = vpop.f32.mrb[41].mxu0 }
 0x597   : > { %v1990_v13 = vadd.f32 %v1989_v5, %v1988_v22 }
 0x599   : > { %1760 = vst [vmem:[%s3877_s20 + $0x20] sm:$0xff] %v1990_v13  ;;  %v1991_v41 = vpop.f32.mrb[42].mxu0 }
 0x59a   : > { %v1992_v17 = vpop.f32.mrb[43].mxu0 }
 0x59b   : > { %v1993_v10 = vadd.f32 %v1992_v17, %v1991_v41 }
 0x59d   : > { %1761 = vst [vmem:[%s3877_s20 + $0x28] sm:$0xff] %v1993_v10  ;;  %v1994_v8 = vpop.f32.mrb[44].mxu0 }
 0x59e   : > { %v1995_v52 = vpop.f32.mrb[45].mxu0 }
 0x59f   : > { %v1996_v33 = vadd.f32 %v1995_v52, %v1994_v8 }
 0x5a1   : > { %1762 = vst [vmem:[%s3877_s20 + $0x30] sm:$0xff] %v1996_v33  ;;  %v1997_v43 = vpop.f32.mrb[46].mxu0 }
 0x5a2   : > { %v1998_v2 = vpop.f32.mrb[47].mxu0 }
 0x5a3   : > { %v1999_v11 = vadd.f32 %v1998_v2, %v1997_v43 }
 0x5a5   : > { %1763 = vst [vmem:[%s3877_s20 + $0x38] sm:$0xff] %v1999_v11  ;;  %v2000_v42 = vpop.f32.mrb[32].mxu1 }
 0x5a6   : > { %v2001_v39 = vpop.f32.mrb[33].mxu1 }
 0x5a7   : > { %v2002_v24 = vadd.f32 %v2001_v39, %v2000_v42 }
 0x5a9   : > { %1764 = vst [vmem:[%s3877_s20 + $0x40] sm:$0xff] %v2002_v24  ;;  %v2003_v37 = vpop.f32.mrb[34].mxu1 }
 0x5aa   : > { %v2004_v61 = vpop.f32.mrb[35].mxu1 }
 0x5ab   : > { %v2005_v26 = vadd.f32 %v2004_v61, %v2003_v37 }
 0x5ad   : > { %1765 = vst [vmem:[%s3877_s20 + $0x48] sm:$0xff] %v2005_v26  ;;  %v2006_v35 = vpop.f32.mrb[36].mxu1 }
 0x5ae   : > { %v2007_v1 = vpop.f32.mrb[37].mxu1 }
 0x5af   : > { %v2008_v46 = vadd.f32 %v2007_v1, %v2006_v35 }
 0x5b1   : > { %1766 = vst [vmem:[%s3877_s20 + $0x50] sm:$0xff] %v2008_v46  ;;  %v2009_v48 = vpop.f32.mrb[38].mxu1 }
 0x5b2   : > { %v2010_v6 = vpop.f32.mrb[39].mxu1 }
 0x5b3   : > { %v2011_v3 = vadd.f32 %v2010_v6, %v2009_v48 }
 0x5b5   : > { %1767 = vst [vmem:[%s3877_s20 + $0x58] sm:$0xff] %v2011_v3  ;;  %v2012_v29 = vpop.f32.mrb[40].mxu1 }
 0x5b6   : > { %v2013_v21 = vpop.f32.mrb[41].mxu1 }
 0x5b7   : > { %v2014_v45 = vadd.f32 %v2013_v21, %v2012_v29 }
 0x5b9   : > { %1768 = vst [vmem:[%s3877_s20 + $0x60] sm:$0xff] %v2014_v45  ;;  %v2015_v9 = vpop.f32.mrb[42].mxu1 }
 0x5ba   : > { %v2016_v59 = vpop.f32.mrb[43].mxu1 }
 0x5bb   : > { %v2017_v53 = vadd.f32 %v2016_v59, %v2015_v9 }
 0x5bd   : > { %1769 = vst [vmem:[%s3877_s20 + $0x68] sm:$0xff] %v2017_v53  ;;  %v2018_v47 = vpop.f32.mrb[44].mxu1 }
 0x5be   : > { %v2019_v32 = vpop.f32.mrb[45].mxu1 }
 0x5bf   : > { %v2020_v18 = vadd.f32 %v2019_v32, %v2018_v47 }
 0x5c1   : > { %1770 = vst [vmem:[%s3877_s20 + $0x70] sm:$0xff] %v2020_v18  ;;  %v2021_v19 = vpop.f32.mrb[46].mxu1 }
 0x5c2   : > { %v2022_v55 = vpop.f32.mrb[47].mxu1 }
 0x5c3   : > { %v2023_v38 = vadd.f32 %v2022_v55, %v2021_v19 }
 0x5c5   : > { %1771 = vst [vmem:[%s3877_s20 + $0x78] sm:$0xff] %v2023_v38 }
 0x5c6   : > { %2604 = shalt.err (!%p2601_p4)
}
 0x5c7   : > { %s2605_s24 = scalar_lea.hbm %s3899_s6, 2048  ;;  %s2609_s21 = scalar_lea.hbm %s3949_s4, 8192 }
 0x5c8   : > { %p2606_p9 = scmp.ne.s32.totalorder %s3899_s6, %s2605_s24  ;;  %p2610_p8 = scmp.lt.u32.totalorder %s3899_s6, %s3949_s4 }
 0x5c9   : > { %p2611_p12 = scmp.lt.u32.totalorder %s2609_s21, %s2605_s24  ;;  %p2613_p0 = scmp.lt.u32.totalorder %s2605_s24, %s3899_s6 }
 0x5ca   : > { %p2607_p13 = pnand %p2606_p9, %p2855_p5 }
 0x5cb   : > { %p2612_p6 = por %p2611_p12, %p2610_p8 }
 0x5cc   : > { %p2608_p10 = pneg %p2607_p13 }
 0x5cd   : > { %p2614_p3 = por %p2613_p0, %p2612_p6 }
 0x5cf   : > { %p2615_p7 = pnand %p2614_p3, %p2608_p10 }
 0x5d1   : > { %2618 = shalt.err (!%p2615_p7)
}
 0x5d2   : > { %s2678_s20 = smov 128   ;;  %s2679_s8 = smov 8  }
 0x5d3   : > { %2214 = dma.vmem_to_hbm [thread:$0]  (%p2855_p5), %s3901_s28, 2048, %s3899_s6, %s1773_s26, %s2678_s20, %s2678_s20, %s2679_s8  }
 0x5d4 PF: > { %p2241_p11 = scmp.ge.s32.totalorder %s2665_s18, 2  ;;  %s1801_s10 = sand.u32 1, %s2653_s15  }
 0x5d5   : > { %p3973_p1 = scmp.ne.s32.totalorder %s3956_s22, 0  ;;  %s1802_s11 = scalar_lea.sflag [#allocation4], %s1801_s10 }
 0x5d7   : > { %p2231_p2 = pnand %p2241_p11, %p3973_p1 }
 0x5d9   : > { %2648 = dma.done.wait (!%p2231_p2), %s1802_s11, 2048  }
 0x5da   : > { %2650 = vsyncadd (!%p2231_p2), %s1802_s11, 4294965248  ;;  %p19_p4 = scmp.ge.s32.totalorder %s2841_s12, 6   ;;  %s3974_s15 = smov %s2657_s16 }
 0x5db   : > { %s3975_s16 = smov %s2661_s17  ;;  %s3976_s17 = smov %s2851_s27 }
 0x5dc   : > { %s3977_s18 = smov %s2841_s12  ;;  %21 = sbr.rel (!%p19_p4) target bundleno = 7 (0x7), region = 93 }
 0x5e3   :  { %1807 = vsyncpa [#allocation3], 1 }
 0x5e4   :  { %1809 = vsyncpa [#allocation3 + $0x1], 1 }
 0x5e5   :  { %1810 = vsyncpa [#allocation6], 1 }
 0x5e6   :  { %1811 = vsyncpa [#allocation9], 1 }
 0x5e7   :  { %1812 = vsyncpa [#allocation4], 1 }
 0x5e8   :  { %1814 = vsyncpa [#allocation4 + $0x1], 1 }

</bundles_post_ra>
